<compile_context>
chip_gen: v7x
topology: tpu7x:2x2x1
jax: 0.10.0
libtpu: 0.0.40
codegen_flags: <defaults>
</compile_context>

<pallas_src>
import math

import jax
import jax.numpy as jnp
from jax.experimental import pallas as pl
from jax.experimental.pallas import tpu as pltpu


def _round_up(n, m):
    return ((n + m - 1) // m) * m


def _cdiv(a, b):
    return -(-a // b)


# ----------------------------------------------------------------------------- kernel


def _make_kernel(n_hidden, compute_dtype=jnp.float32):
    """Fused kernel: input layer + `n_hidden` hidden tanh layers + output layer."""
    is_f32 = compute_dtype == jnp.float32
    prec = jax.lax.Precision.HIGHEST if is_f32 else jax.lax.Precision.DEFAULT

    def _mm(a, b, dimension_numbers=None):
        a = a.astype(compute_dtype)
        b = b.astype(compute_dtype)
        if dimension_numbers is None:
            return jnp.dot(a, b, preferred_element_type=jnp.float32, precision=prec)
        return jax.lax.dot_general(
            a, b, dimension_numbers=dimension_numbers,
            preferred_element_type=jnp.float32, precision=prec)

    def kernel(*refs):
        x_ref = refs[0]                         # [TB, input_size]   (native layout)
        w_in_ref, b_in_ref = refs[1], refs[2]   # [width, input_size], [width, 1]
        if n_hidden > 0:
            w_h_ref, b_h_ref = refs[3], refs[4]        # [L, width, width], [L, width, 1]
            w_out_ref, b_out_ref = refs[5], refs[6]    # [out, width], [out, 1]
        else:
            w_out_ref, b_out_ref = refs[3], refs[4]
        o_ref = refs[-1]                        # [out, TB]  (lane-dense store)

        # First layer: contract x's feature axis directly (== W_in @ x_tile.T).
        # Result is [width, TB] — batch on the lane axis, no explicit transpose.
        h = jnp.tanh(
            _mm(w_in_ref[...], x_ref[...],
                dimension_numbers=(((1,), (1,)), ((), ())))
            + b_in_ref[...]
        )
        # Statically unrolled hidden layers over the stacked weights.
        # TODO(synk): for very large L*width^2 (tens of MB, v7x 64 MiB VMEM) move
        # this loop onto a second "arbitrary" grid axis streaming one layer at a time.
        for l in range(n_hidden):
            h = jnp.tanh(_mm(w_h_ref[l], h) + b_h_ref[l])

        y = _mm(w_out_ref[...], h) + b_out_ref[...]
        # sigmoid(y) * 0.5 + 0.05  ==  0.25 * tanh(0.5 * y) + 0.3   (1 EUP op + 1 fma)
        o_ref[...] = (0.25 * jnp.tanh(0.5 * y) + 0.3).astype(o_ref.dtype)

    return kernel


# ------------------------------------------------------------------- parameter packing


def prepare_params(layer_weights, layer_biases, out_w, out_b):
    """One-time packing of PyTorch-layout parameters (hoisted out of the call path)."""
    width = layer_weights[0].shape[0]
    n_hidden = len(layer_weights) - 1
    params = {
        "n_hidden": n_hidden,
        "w_in": jnp.asarray(layer_weights[0], jnp.float32),               # [width, in]
        "b_in": jnp.asarray(layer_biases[0], jnp.float32).reshape(width, 1),
        "w_out": jnp.asarray(out_w, jnp.float32),                         # [out, width]
        "b_out": jnp.asarray(out_b, jnp.float32).reshape(-1, 1),
    }
    if n_hidden > 0:
        params["w_h"] = jnp.stack(
            [jnp.asarray(w, jnp.float32) for w in layer_weights[1:]])     # [L, w, w]
        params["b_h"] = jnp.stack(
            [jnp.asarray(b, jnp.float32).reshape(width, 1)
             for b in layer_biases[1:]])                                  # [L, w, 1]
    return params


# ------------------------------------------------------------------------ tiling logic


def _choose_tile(batch, block_batch):
    """Pick a large, balanced, MXU-aligned batch tile.

    - big tiles amortize the ~0.35-0.6 us per-grid-step overhead,
    - >=2 steps when batch>=512 keeps both v7x TensorCores busy,
    - balancing across steps caps padding waste below one alignment unit,
    - multiples of 256 fill the 256-wide MXU of v6e/v7x (128 suffices on v5e).
    """
    n_steps = max(1, _cdiv(batch, max(block_batch, 128)))
    if batch >= 512:
        n_steps = max(n_steps, 2)
    per_step = _cdiv(batch, n_steps)
    align = 256 if per_step >= 256 else 128
    tb = _round_up(per_step, align)
    if tb >= batch:
        return batch, 1          # single full-extent block (always a legal BlockSpec)
    return tb, _cdiv(batch, tb)


def _vmem_bytes(tb, input_size, width, output_size, n_hidden):
    """Rough per-step VMEM footprint (f32, padded to the (8,128) vreg layout)."""
    f32, lane, sub = 4, 128, 8
    pad = lambda n, m: _round_up(max(int(n), 1), m)
    x_blk = pad(tb, sub) * pad(input_size, lane) * f32 * 2      # double-buffered x tile
    o_blk = pad(output_size, sub) * pad(tb, lane) * f32 * 2     # double-buffered out tile
    h_tmp = pad(width, sub) * pad(tb, lane) * f32 * 4           # live activation temps
    w_res = (pad(width, sub) * pad(input_size, lane)
             + n_hidden * pad(width, sub) * pad(width, lane)
             + pad(output_size, sub) * pad(width, lane)) * f32  # single-buffered weights
    b_res = (n_hidden + 2) * pad(width, sub) * lane * f32
    return x_blk + o_blk + h_tmp + w_res + b_res


# ---------------------------------------------------------------------------- wrapper


def net_old_forward(x, params, *, block_batch=4096, compute_dtype=jnp.float32):
    """Pallas implementation of Net_old.forward.

    Args:
      x: [batch, input_size] float32 (native PyTorch layout, no pre-transpose).
      params: output of prepare_params().
      block_batch: requested batch tile (large by default; balanced/aligned inside).
      compute_dtype: jnp.float32 (default, 1e-5 accurate) or jnp.bfloat16 (v6e/v7x).
    Returns:
      [batch, output_size] float32.
    """
    batch, input_size = x.shape
    n_hidden = params["n_hidden"]
    width = params["w_in"].shape[0]
    output_size = params["w_out"].shape[0]

    tb, grid_b = _choose_tile(batch, block_batch)

    def invariant(shape):
        # Grid-invariant block: DMA'd once, kept single-buffered in VMEM.
        return pl.BlockSpec(shape, lambda i: (0,) * len(shape),
                            pipeline_mode=pl.Buffered(1))

    args = [x, params["w_in"], params["b_in"]]
    in_specs = [
        pl.BlockSpec((tb, input_size), lambda i: (i, 0)),   # native x layout
        invariant(params["w_in"].shape),
        invariant(params["b_in"].shape),
    ]
    if n_hidden > 0:
        args += [params["w_h"], params["b_h"]]
        in_specs += [invariant(params["w_h"].shape), invariant(params["b_h"].shape)]
    args += [params["w_out"], params["b_out"]]
    in_specs += [invariant(params["w_out"].shape), invariant(params["b_out"].shape)]

    vmem_limit = int(min(
        max(1.5 * _vmem_bytes(tb, input_size, width, output_size, n_hidden),
            32 * 1024 * 1024),
        60 * 1024 * 1024))                       # stay under v7x's 64 MiB physical VMEM

    y_t = pl.pallas_call(
        _make_kernel(n_hidden, compute_dtype),
        out_shape=jax.ShapeDtypeStruct((output_size, batch), jnp.float32),
        grid=(grid_b,),
        in_specs=in_specs,
        out_specs=pl.BlockSpec((output_size, tb), lambda i: (0, i)),   # lane-dense
        compiler_params=pltpu.CompilerParams(
            dimension_semantics=("parallel",),   # shard batch grid across TCs (v7x)
            vmem_limit_bytes=vmem_limit,
        ),
    )(*args)

    # Back to PyTorch's [batch, output_size]; trivial reshape-like for output_size==1.
    return y_t.T


# ------------------------------------------------------------------------------ test


def _init_linear(key, in_features, out_features):
    """Deterministic PyTorch-style Linear init (weight [out, in], bias [out])."""
    k_w, k_b = jax.random.split(key)
    bound = 1.0 / math.sqrt(in_features)
    w = jax.random.uniform(k_w, (out_features, in_features), jnp.float32, -bound, bound)
    b = jax.random.uniform(k_b, (out_features,), jnp.float32, -bound, bound)
    return w, b


def _reference_forward(x, layer_weights, layer_biases, out_w, out_b):
    h = x
    for w, b in zip(layer_weights, layer_biases):
        h = jnp.tanh(h @ w.T + b)
    y = h @ out_w.T + out_b
    return jax.nn.sigmoid(y) * 0.5 + 0.05


if __name__ == "__main__":
    # Small shapes consistent with the module: depth=2 tanh layers,
    # input_size=4, width=32, output_size=1.  batch=512 with block_batch=256
    # exercises a 2-step batch grid (pipelining + v7x core split) while tiny.
    depth = 2
    input_size = 4
    width = 32
    output_size = 1
    batch = 512

    key = jax.random.PRNGKey(0)
    keys = jax.random.split(key, depth + 2)

    layer_weights, layer_biases = [], []
    fan_in = input_size
    for i in range(depth):
        w, b = _init_linear(keys[i], fan_in, width)
        layer_weights.append(w)
        layer_biases.append(b)
        fan_in = width
    out_w, out_b = _init_linear(keys[depth], width, output_size)

    x = jax.random.normal(keys[depth + 1], (batch, input_size), jnp.float32)

    params = prepare_params(layer_weights, layer_biases, out_w, out_b)
    out = net_old_forward(x, params, block_batch=256)
    out = jax.block_until_ready(out)

    ref = _reference_forward(x, layer_weights, layer_biases, out_w, out_b)
    assert out.shape == (batch, output_size)
    assert jnp.allclose(out, ref, atol=1e-5, rtol=1e-5)

    print("KERNEL_OK")
</pallas_src>

<mosaic_0001>
module attributes {stable_mosaic.version = 11 : i64} {
  func.func @kernel(%arg0: i32, %arg1: memref<256x4xf32, #tpu.memory_space<vmem>>, %arg2: memref<32x4xf32, #tpu.memory_space<vmem>>, %arg3: memref<32x1xf32, #tpu.memory_space<vmem>>, %arg4: memref<1x32x32xf32, #tpu.memory_space<vmem>>, %arg5: memref<1x32x1xf32, #tpu.memory_space<vmem>>, %arg6: memref<1x32xf32, #tpu.memory_space<vmem>>, %arg7: memref<1x1xf32, #tpu.memory_space<vmem>>, %arg8: memref<1x256xf32, #tpu.memory_space<vmem>>) attributes {dimension_semantics = [#tpu.dimension_semantics<parallel>], iteration_bounds = array<i64: 2>, scalar_prefetch = 0 : i64, scratch_operands = 0 : i64, tpu.core_type = #tpu.core_type<tc>, window_params = [{transform_indices = @transform_0, window_bounds = array<i64: 256, 4>}, {pipeline_mode = #tpu.pipeline_mode<synchronous>, transform_indices = @transform_1, window_bounds = array<i64: 32, 4>}, {pipeline_mode = #tpu.pipeline_mode<synchronous>, transform_indices = @transform_2, window_bounds = array<i64: 32, 1>}, {pipeline_mode = #tpu.pipeline_mode<synchronous>, transform_indices = @transform_3, window_bounds = array<i64: 1, 32, 32>}, {pipeline_mode = #tpu.pipeline_mode<synchronous>, transform_indices = @transform_4, window_bounds = array<i64: 1, 32, 1>}, {pipeline_mode = #tpu.pipeline_mode<synchronous>, transform_indices = @transform_5, window_bounds = array<i64: 1, 32>}, {pipeline_mode = #tpu.pipeline_mode<synchronous>, transform_indices = @transform_6, window_bounds = array<i64: 1, 1>}, {transform_indices = @transform_7, window_bounds = array<i64: 1, 256>}]} {
    %c0 = arith.constant 0 : index
    %c0_0 = arith.constant 0 : index
    %0 = vector.load %arg2[%c0, %c0_0] : memref<32x4xf32, #tpu.memory_space<vmem>>, vector<32x4xf32>
    %c0_1 = arith.constant 0 : index
    %c0_2 = arith.constant 0 : index
    %1 = vector.load %arg1[%c0_1, %c0_2] : memref<256x4xf32, #tpu.memory_space<vmem>>, vector<256x4xf32>
    %cst = arith.constant dense<0.000000e+00> : vector<32x256xf32>
    %2 = tpu.matmul %0, %1, %cst {dimension_numbers = #tpu.dot_dimension_numbers<[1], [1], [0], [0], [0, 0, 1, 0], [], []>, precision = #tpu.contract_precision<fp32>} : vector<32x4xf32>, vector<256x4xf32>, vector<32x256xf32> -> vector<32x256xf32>
    %c0_3 = arith.constant 0 : index
    %c0_4 = arith.constant 0 : index
    %3 = vector.load %arg3[%c0_3, %c0_4] : memref<32x1xf32, #tpu.memory_space<vmem>>, vector<32x1xf32>
    %4 = vector.broadcast %3 : vector<32x1xf32> to vector<32x256xf32>
    %5 = arith.addf %2, %4 : vector<32x256xf32>
    %6 = math.tanh %5 : vector<32x256xf32>
    %c0_5 = arith.constant 0 : index
    %c0_6 = arith.constant 0 : index
    %c0_7 = arith.constant 0 : index
    %7 = vector.load %arg4[%c0_5, %c0_6, %c0_7] : memref<1x32x32xf32, #tpu.memory_space<vmem>>, vector<1x32x32xf32>
    %8 = vector.shape_cast %7 : vector<1x32x32xf32> to vector<32x32xf32>
    %cst_8 = arith.constant dense<0.000000e+00> : vector<32x256xf32>
    %9 = tpu.matmul %8, %6, %cst_8 {dimension_numbers = #tpu.dot_dimension_numbers<[1], [0], [0], [1], [0, 0, 1, 1], [], []>, precision = #tpu.contract_precision<fp32>} : vector<32x32xf32>, vector<32x256xf32>, vector<32x256xf32> -> vector<32x256xf32>
    %c0_9 = arith.constant 0 : index
    %c0_10 = arith.constant 0 : index
    %c0_11 = arith.constant 0 : index
    %10 = vector.load %arg5[%c0_9, %c0_10, %c0_11] : memref<1x32x1xf32, #tpu.memory_space<vmem>>, vector<1x32x1xf32>
    %11 = vector.shape_cast %10 : vector<1x32x1xf32> to vector<32x1xf32>
    %12 = vector.broadcast %11 : vector<32x1xf32> to vector<32x256xf32>
    %13 = arith.addf %9, %12 : vector<32x256xf32>
    %14 = math.tanh %13 : vector<32x256xf32>
    %c0_12 = arith.constant 0 : index
    %c0_13 = arith.constant 0 : index
    %15 = vector.load %arg6[%c0_12, %c0_13] : memref<1x32xf32, #tpu.memory_space<vmem>>, vector<1x32xf32>
    %cst_14 = arith.constant dense<0.000000e+00> : vector<1x256xf32>
    %16 = tpu.matmul %15, %14, %cst_14 {dimension_numbers = #tpu.dot_dimension_numbers<[1], [0], [0], [1], [0, 0, 1, 1], [], []>, precision = #tpu.contract_precision<fp32>} : vector<1x32xf32>, vector<32x256xf32>, vector<1x256xf32> -> vector<1x256xf32>
    %c0_15 = arith.constant 0 : index
    %c0_16 = arith.constant 0 : index
    %17 = vector.load %arg7[%c0_15, %c0_16] : memref<1x1xf32, #tpu.memory_space<vmem>>, vector<1x1xf32>
    %18 = vector.broadcast %17 : vector<1x1xf32> to vector<1x256xf32>
    %19 = arith.addf %16, %18 : vector<1x256xf32>
    %cst_17 = arith.constant 5.000000e-01 : f32
    %20 = vector.broadcast %cst_17 : f32 to vector<1x256xf32>
    %21 = arith.mulf %20, %19 : vector<1x256xf32>
    %22 = math.tanh %21 : vector<1x256xf32>
    %cst_18 = arith.constant 2.500000e-01 : f32
    %23 = vector.broadcast %cst_18 : f32 to vector<1x256xf32>
    %24 = arith.mulf %23, %22 : vector<1x256xf32>
    %cst_19 = arith.constant 3.000000e-01 : f32
    %25 = vector.broadcast %cst_19 : f32 to vector<1x256xf32>
    %26 = arith.addf %24, %25 : vector<1x256xf32>
    %c0_20 = arith.constant 0 : index
    %c0_21 = arith.constant 0 : index
    %27 = vector.load %arg8[%c0_20, %c0_21] : memref<1x256xf32, #tpu.memory_space<vmem>>, vector<1x256xf32>
    tpu.vector_store %arg8[%c0_20, %c0_21], %26 {strides = array<i32>} : memref<1x256xf32, #tpu.memory_space<vmem>>, vector<1x256xf32>,
    return
  }
  func.func @transform_0(%arg0: i32) -> (i32, i32) {
    %c0_i32 = arith.constant 0 : i32
    %c0_i32_0 = arith.constant 0 : i32
    return %arg0, %c0_i32 : i32, i32
  }
  func.func @transform_1(%arg0: i32) -> (i32, i32) {
    %c0_i32 = arith.constant 0 : i32
    %c0_i32_0 = arith.constant 0 : i32
    %c0_i32_1 = arith.constant 0 : i32
    return %c0_i32, %c0_i32_0 : i32, i32
  }
  func.func @transform_2(%arg0: i32) -> (i32, i32) {
    %c0_i32 = arith.constant 0 : i32
    %c0_i32_0 = arith.constant 0 : i32
    %c0_i32_1 = arith.constant 0 : i32
    return %c0_i32, %c0_i32_0 : i32, i32
  }
  func.func @transform_3(%arg0: i32) -> (i32, i32, i32) {
    %c0_i32 = arith.constant 0 : i32
    %c0_i32_0 = arith.constant 0 : i32
    %c0_i32_1 = arith.constant 0 : i32
    %c0_i32_2 = arith.constant 0 : i32
    return %c0_i32, %c0_i32_0, %c0_i32_1 : i32, i32, i32
  }
  func.func @transform_4(%arg0: i32) -> (i32, i32, i32) {
    %c0_i32 = arith.constant 0 : i32
    %c0_i32_0 = arith.constant 0 : i32
    %c0_i32_1 = arith.constant 0 : i32
    %c0_i32_2 = arith.constant 0 : i32
    return %c0_i32, %c0_i32_0, %c0_i32_1 : i32, i32, i32
  }
  func.func @transform_5(%arg0: i32) -> (i32, i32) {
    %c0_i32 = arith.constant 0 : i32
    %c0_i32_0 = arith.constant 0 : i32
    %c0_i32_1 = arith.constant 0 : i32
    return %c0_i32, %c0_i32_0 : i32, i32
  }
  func.func @transform_6(%arg0: i32) -> (i32, i32) {
    %c0_i32 = arith.constant 0 : i32
    %c0_i32_0 = arith.constant 0 : i32
    %c0_i32_1 = arith.constant 0 : i32
    return %c0_i32, %c0_i32_0 : i32, i32
  }
  func.func @transform_7(%arg0: i32) -> (i32, i32) {
    %c0_i32 = arith.constant 0 : i32
    %c0_i32_0 = arith.constant 0 : i32
    return %c0_i32, %arg0 : i32, i32
  }
}

</mosaic_0001>

<bundles_post_ra>
// kernel: tpu_custom_call.1
= control target key start
LH: loop header
LB: loop body
LE: loop exit
PB: predicated region body
PF: predicated region fallthrough
CT: control target
= control target key end

     0   :  { %s4767_s0 = inlined_call_operand.vmem [shape: f32[512,4], index: 0, kind: input, shape index: {}]   ;;  %s4768_s1 = inlined_call_operand.vmem [shape: f32[32,4], index: 1, kind: input, shape index: {}]   ;;  %s4769_s2 = inlined_call_operand.vmem [shape: f32[32,1], index: 2, kind: input, shape index: {}]   ;;  %s4770_s3 = inlined_call_operand.vmem [shape: f32[1,32,32], index: 3, kind: input, shape index: {}]   ;;  %s4771_s4 = inlined_call_operand.vmem [shape: f32[1,32,1], index: 4, kind: input, shape index: {}]   ;;  %s4772_s5 = inlined_call_operand.vmem [shape: f32[1,32], index: 5, kind: input, shape index: {}]   ;;  %s4773_s6 = inlined_call_operand.<no memory space> [shape: f32[1,1], index: 6, kind: input, shape index: {}]   ;;  %s4774_s7 = inlined_call_operand.hbm [shape: f32[1,512], index: 7, kind: output, shape index: {}]  }
   0x1   :  { %v12_v0 = vstv %s4773_s6 }
   0x2   :  { %13 = vst [vmem:[#allocation2] sm:$0x1] %v12_v0 }
   0x3   :  { %14 = vsyncpa [#allocation4], 0 }
   0x4   :  { %16 = vsyncpa [#allocation4 + $0x1], 0  ;;  %s3702_s26 = smov 0   ;;  %s3704_s27 = smov 0  }
   0x5   :  { %s3706_s28 = smov 0   ;;  %s3708_s29 = smov 0  }
   0x6 LB: > { %s2861_s6 = sadd.s32 4294967295, %s3653_s29   ;;  %s2862_s30 = sadd.s32 4294967294, %s3653_s29   ;;  %s3653_s29 = sphi %s3708_s29, %s4902_s29   ;;  %s3649_s28 = sphi %s3706_s28, %s4901_s28   ;;  %s3645_s27 = sphi %s3704_s27, %s4900_s27   ;;  %s3641_s26 = sphi %s3702_s26, %s4899_s26  }
   0x7   : > { %s3725_s8 = sadd.s32 1, %s3653_s29   ;;  %s181_s9 = sadd.s32 1, %s3649_s28 }
   0x8   : > { %s178_s10 = ssub.s32 %s3653_s29, %s3725_s8  ;;  %p191_p0 = scmp.ne.s32.totalorder %s3649_s28, %s3645_s27 }
   0x9   : > { %p179_p1 = scmp.eq.s32.totalorder %s178_s10, 0  ;;  %p192_p2 = scmp.eq.s32.totalorder %s2861_s6, 1 }
   0xa   : > { %p197_p3 = scmp.ne.s32.totalorder %s3645_s27, %s3641_s26  ;;  %p198_p4 = scmp.eq.s32.totalorder %s2862_s30, 1 }
   0xb   : > { %s3735_s11 = scalar_select %p179_p1, %s3649_s28, %s181_s9  }
   0xc   : > { %p3737_p5 = por %p192_p2, %p191_p0  ;;  %p3741_p6 = por %p198_p4, %p197_p3 }
   0xd   : > { %p2865_p7 = scmp.ge.s32.totalorder %s3653_s29, 1  ;;  %p243_p8 = scmp.lt.s32.totalorder %s3653_s29, 3 }
   0xf   : > { %p244_p9 = pnand %p2865_p7, %p243_p8 }
  0x11   : > { %247 = sbr.rel (%p244_p9) target bundleno = 1163 (0x48b), region = 48 }
  0x18   : > { %s3747_s14 = sshll.u32 %s2861_s6, 5  ;;  %vm342_vm0 = vcmask 31744   ;;  %v282_v1 = vld [vmem:[%s4768_s1] sm:$0xff]  ;;  %vm1489_vm1 = vcmask 261120   ;;  %s272_s24 = sand.u32 1, %s3645_s27  }
  0x19   : > { %p276_p10 = scmp.lt.s32.totalorder %s3747_s14, 63  ;;  %v344_v2 = vsel %vm342_vm0, %v282_v1, 0  ;;  %s2866_s25 = sshll.u32 %s272_s24, 1 }
  0x1a   : > { %v3754_v3 = vand.u32 4294901760, %v344_v2  ;;  %s274_s6 = scalar_lea.vmem [#allocation3], %s2866_s25  ;;  %s4725_s15 = scalar_lea.hbm %s4774_s7, %s3747_s14 }
  0x1b   : > { %s277_s17 = scalar_select %p276_p10, %s3747_s14, 63 }
  0x1c   : > { %4819 = vst [vmem:[#allocation6_spill] sm:$0xff] %v3754_v3  ;;  %v3758_v4 = vsub.f32 %v344_v2, %v3754_v3  ;;  %s2803_s30 = sshll.u32 %s274_s6, 4  ;;  %s2789_s16 = scalar_lea.sflag [#allocation4], %s272_s24  ;;  %s4727_s30 = int_to_ptr.vmem [resolvable:$true] %s2803_s30 }
  0x1d   : > { %s2868_s18 = sshll.u32 %s277_s17, 3  ;;  %s3591_s17 = scalar_lea.vmem %s4727_s30, 32 }
  0x1e   : > { %s3763_s21 = scalar_lea.vmem %s4767_s0, %s2868_s18  ;;  %2987 = vmatprep.mubr.f32.mxu0 %v3758_v4  ;;  %p3592_p11 = scmp.ne.s32.totalorder %s4727_s30, %s3591_s17 }
  0x1f   : > { %v302_v5 = vld [vmem:[%s3763_s21 + $0x80] sm:$0xff]  ;;  %v303_v6 = vld [vmem:[%s3763_s21 + $0x88] sm:$0xff]  ;;  %v304_v12 = vld [vmem:[%s3763_s21 + $0x90] sm:$0xff]  ;;  %s3658_s18 = smov [#allocation3]  }
  0x20   : > { %v286_v7 = vld [vmem:[%s3763_s21] sm:$0xff]  ;;  %v3770_v8 = vsel %vm342_vm0, %v302_v5, 0  ;;  %v3773_v9 = vsel %vm342_vm0, %v303_v6, 0  ;;  %v287_v10 = vld [vmem:[%s3763_s21 + $0x8] sm:$0xff]  ;;  %v305_v13 = vld [vmem:[%s3763_s21 + $0x98] sm:$0xff]  ;;  %v3791_v21 = vsel %vm342_vm0, %v304_v12, 0  ;;  %p3593_p12 = pnand %p3592_p11, %p3737_p5 }
  0x21   : > { %v3777_v11 = vsel %vm342_vm0, %v286_v7, 0  ;;  %v4792_v14 = vand.u32 4294901760, %v3770_v8  ;;  %v4791_v15 = vand.u32 4294901760, %v3773_v9  ;;  %v3784_v16 = vsel %vm342_vm0, %v287_v10, 0  ;;  %v288_v18 = vld [vmem:[%s3763_s21 + $0x10] sm:$0xff]  ;;  %v289_v19 = vld [vmem:[%s3763_s21 + $0x18] sm:$0xff] }
  0x22   : > { %v4789_v17 = vand.u32 4294901760, %v3777_v11  ;;  %v4787_v20 = vand.u32 4294901760, %v3784_v16  ;;  %v3794_v22 = vsel %vm342_vm0, %v305_v13, 0  ;;  %v3797_v23 = vsel %vm342_vm0, %v288_v18, 0  ;;  %v306_v32 = vld [vmem:[%s3763_s21 + $0xa0] sm:$0xff]  ;;  %v307_v33 = vld [vmem:[%s3763_s21 + $0xa8] sm:$0xff]  ;;  %p3594_p13 = pneg %p3593_p12 }
  0x23   : > { %v3802_v24 = vsub.f32 %v3770_v8, %v4792_v14  ;;  %v3807_v25 = vsub.f32 %v3773_v9, %v4791_v15  ;;  %v4786_v27 = vand.u32 4294901760, %v3791_v21  ;;  %v4784_v29 = vand.u32 4294901760, %v3794_v22  ;;  %v290_v34 = vld [vmem:[%s3763_s21 + $0x20] sm:$0xff]  ;;  %v291_v38 = vld [vmem:[%s3763_s21 + $0x28] sm:$0xff]  ;;  %v308_v42 = vld [vmem:[%s3763_s21 + $0xb0] sm:$0xff]  ;;  %s3595_s19 = sshll.u32 %s3658_s18, 4  ;;  %s3596_s19 = int_to_ptr.vmem [resolvable:$false] %s3595_s19 }
  0x24   : > { %v3812_v26 = vsub.f32 %v3777_v11, %v4789_v17  ;;  %v3818_v28 = vsub.f32 %v3784_v16, %v4787_v20  ;;  %v3822_v30 = vsel %vm342_vm0, %v289_v19, 0  ;;  %v4783_v31 = vand.u32 4294901760, %v3797_v23  ;;  %v309_v47 = vld [vmem:[%s3763_s21 + $0xb8] sm:$0xff]  ;;  %v292_v52 = vld [vmem:[%s3763_s21 + $0x30] sm:$0xff]  ;;  %v310_v61 = vld [vmem:[%s3763_s21 + $0xc0] sm:$0xff]  ;;  %s3597_s20 = scalar_lea.vmem %s3596_s19, 64  ;;  %p3598_p0 = scmp.lt.s32.totalorder %s4727_s30, %s3596_s19 }
  0x25   : > { %v3179_v35 = vpack.c.bf16 %v3807_v25, %v3802_v24  ;;  %v3833_v36 = vsub.f32 %v3791_v21, %v4786_v27  ;;  %v4782_v37 = vand.u32 4294901760, %v3822_v30  ;;  %v3842_v40 = vsub.f32 %v3794_v22, %v4784_v29  ;;  %v293_v56 = vld [vmem:[%s3763_s21 + $0x38] sm:$0xff]  ;;  %v311_v0 = vld [vmem:[%s3763_s21 + $0xc8] sm:$0xff]  ;;  %v294_v1 = vld [vmem:[%s3763_s21 + $0x40] sm:$0xff]  ;;  %p3599_p1 = scmp.lt.s32.totalorder %s3597_s20, %s3591_s17 }
  0x26   : > { %v3181_v39 = vpack.c.bf16 %v3818_v28, %v3812_v26  ;;  %v3847_v41 = vsub.f32 %v3797_v23, %v4783_v31  ;;  %v3856_v44 = vsel %vm342_vm0, %v306_v32, 0  ;;  %v3859_v45 = vsel %vm342_vm0, %v307_v33, 0  ;;  %v295_v7 = vld [vmem:[%s3763_s21 + $0x48] sm:$0xff]  ;;  %v312_v19 = vld [vmem:[%s3763_s21 + $0xd0] sm:$0xff]  ;;  %v317_v14 = vld [vmem:[%s3763_s21 + $0xf8] sm:$0xff] }
  0x27   : > { %3180 = vmatprep.subr.bf16.mxu0 %v3179_v35  ;;  %v3853_v43 = vsub.f32 %v3822_v30, %v4782_v37  ;;  %v3862_v46 = vsel %vm342_vm0, %v290_v34, 0  ;;  %v3183_v48 = vpack.c.bf16 %v3842_v40, %v3833_v36  ;;  %v4781_v49 = vand.u32 4294901760, %v3856_v44  ;;  %p3600_p2 = por %p3599_p1, %p3598_p0 }
  0x28   : > { %3182 = vmatpush3.bf16.xpose.msra.mxu0 %v3181_v39  ;;  %v4779_v50 = vand.u32 4294901760, %v3859_v45  ;;  %v3870_v51 = vsel %vm342_vm0, %v291_v38, 0  ;;  %v4778_v53 = vand.u32 4294901760, %v3862_v46  ;;  %v3876_v55 = vsel %vm342_vm0, %v308_v42, 0  ;;  %v313_v38 = vld [vmem:[%s3763_s21 + $0xd8] sm:$0xff] }
  0x29   : > { %v4777_v54 = vand.u32 4294901760, %v3870_v51  ;;  %3184 = vmatprep.subr.bf16.mxu0 %v3183_v48  ;;  %v3882_v57 = vsub.f32 %v3856_v44, %v4781_v49  ;;  %v3890_v59 = vsel %vm342_vm0, %v309_v47, 0  ;;  %v4776_v60 = vand.u32 4294901760, %v3876_v55  ;;  %v296_v48 = vld [vmem:[%s3763_s21 + $0x50] sm:$0xff]  ;;  %p3601_p3 = pnand %p3600_p2, %p3594_p13 }
  0x2a   : > { %v3887_v58 = vsub.f32 %v3859_v45, %v4779_v50  ;;  %v4775_v62 = vand.u32 4294901760, %v3890_v59  ;;  %v3896_v63 = vsel %vm342_vm0, %v292_v52, 0  ;;  %v3185_v2 = vpack.c.bf16 %v3853_v43, %v3847_v41  ;;  %v315_v50 = vld [vmem:[%s3763_s21 + $0xe8] sm:$0xff] }
  0x2b   : > { %v3905_v5 = vsub.f32 %v3862_v46, %v4778_v53  ;;  %v3908_v6 = vsel %vm342_vm0, %v293_v56, 0  ;;  %v3916_v12 = vsub.f32 %v3870_v51, %v4777_v54  ;;  %v4780_v13 = vand.u32 4294901760, %v3896_v63 }
  0x2c   : > { %v3187_v10 = vpack.c.bf16 %v3887_v58, %v3882_v57  ;;  %v3920_v18 = vsel %vm342_vm0, %v310_v61, 0  ;;  %v3926_v32 = vsub.f32 %v3876_v55, %v4776_v60  ;;  %v3931_v33 = vsub.f32 %v3890_v59, %v4775_v62  ;;  %v297_v61 = vld [vmem:[%s3763_s21 + $0x58] sm:$0xff] }
  0x2d   : > { %v3934_v34 = vsel %vm342_vm0, %v311_v0, 0  ;;  %v3937_v35 = vsel %vm342_vm0, %v294_v1, 0  ;;  %v4785_v39 = vand.u32 4294901760, %v3908_v6  ;;  %v4788_v42 = vand.u32 4294901760, %v3920_v18 }
  0x2e   : > { %v3943_v47 = vsel %vm342_vm0, %v295_v7, 0  ;;  %v4790_v52 = vand.u32 4294901760, %v3934_v34  ;;  %v3948_v56 = vsel %vm342_vm0, %v312_v19, 0  ;;  %v3952_v0 = vand.u32 4294901760, %v3758_v4  ;;  %v314_v19 = vld [vmem:[%s3763_s21 + $0xe0] sm:$0xff] }
  0x2f   : > { %4820 = vst [vmem:[#allocation7_spill] sm:$0xff] %v3943_v47  ;;  %4821 = vst [vmem:[#allocation8_spill] sm:$0xff] %v3948_v56  ;;  %v3189_v1 = vpack.c.bf16 %v3916_v12, %v3905_v5  ;;  %v3959_v7 = vsub.f32 %v3896_v63, %v4780_v13  ;;  %v3963_v62 = vsel %vm342_vm0, %v313_v38, 0  ;;  %v3191_v60 = vpack.c.bf16 %v3931_v33, %v3926_v32  ;;  %v298_v13 = vld [vmem:[%s3763_s21 + $0x60] sm:$0xff] }
  0x30   : > { %3186 = vmatpush3.bf16.xpose.msra.mxu0 %v3185_v2  ;;  %v4793_v2 = vand.u32 4294901760, %v3937_v35  ;;  %4822 = vst [vmem:[#allocation9_spill] sm:$0xff] %v3963_v62  ;;  %v4797_v54 = vand.u32 4294901760, %v3948_v56  ;;  %v3971_v53 = vsel %vm342_vm0, %v296_v48, 0  ;;  %v3978_v38 = vsub.f32 %v3908_v6, %v4785_v39  ;;  %v299_v48 = vld [vmem:[%s3763_s21 + $0x68] sm:$0xff] }
  0x31   : > { %3188 = vmatprep.subr.bf16.mxu0 %v3187_v10  ;;  %v4794_v10 = vand.u32 4294901760, %v3943_v47  ;;  %4823 = vst [vmem:[#allocation10_spill] sm:$0xff] %v3971_v53  ;;  %v3983_v49 = vsub.f32 %v3920_v18, %v4788_v42  ;;  %v4800_v37 = vand.u32 4294901760, %v3963_v62  ;;  %v3987_v31 = vsel %vm342_vm0, %v297_v61, 0  ;;  %v316_v42 = vld [vmem:[%s3763_s21 + $0xf0] sm:$0xff] }
  0x32   : > { %4824 = vst [vmem:[#allocation11_spill] sm:$0xff] %v3987_v31  ;;  %v3993_v29 = vsub.f32 %v3934_v34, %v4790_v52  ;;  %v3998_v20 = vsel %vm342_vm0, %v314_v19, 0  ;;  %v4004_v61 = vsub.f32 %v3937_v35, %v4793_v2  ;;  %v4007_v17 = vsel %vm342_vm0, %v315_v50, 0  ;;  %v300_v52 = vld [vmem:[%s3763_s21 + $0x70] sm:$0xff] }
  0x33   : > { %4825 = vst [vmem:[#allocation12_spill] sm:$0xff] %v3998_v20  ;;  %4826 = vst [vmem:[#allocation13_spill] sm:$0xff] %v4007_v17  ;;  %v4011_v15 = vsel %vm342_vm0, %v298_v13, 0  ;;  %v4017_v19 = vsub.f32 %v3943_v47, %v4794_v10  ;;  %v4022_v27 = vsub.f32 %v3948_v56, %v4797_v54  ;;  %v4026_v50 = vsel %vm342_vm0, %v299_v48, 0  ;;  %v301_v54 = vld [vmem:[%s3763_s21 + $0x78] sm:$0xff] }
  0x34   : > { %4827 = vst [vmem:[#allocation14_spill] sm:$0xff] %v4011_v15  ;;  %4828 = vst [vmem:[#allocation15_spill] sm:$0xff] %v4026_v50  ;;  %v4032_v13 = vsub.f32 %v3963_v62, %v4800_v37  ;;  %v4037_v3 = vsel %vm342_vm0, %v316_v42, 0  ;;  %v4830_v2 = vand.u32 4294901760, %v3971_v53  ;;  %v4831_v56 = vand.u32 4294901760, %v3987_v31 }
  0x35   : > { %4829 = vst [vmem:[#allocation16_spill] sm:$0xff] %v4037_v3  ;;  %v4051_v37 = vsel %vm342_vm0, %v317_v14, 0  ;;  %v4833_v42 = vand.u32 4294901760, %v3998_v20  ;;  %v4834_v39 = vand.u32 4294901760, %v4007_v17  ;;  %v4836_v14 = vand.u32 4294901760, %v4011_v15 }
  0x36   : > { %v4043_v48 = vsub.f32 %v3971_v53, %v4830_v2  ;;  %v4048_v47 = vsub.f32 %v3987_v31, %v4831_v56  ;;  %4832 = vst [vmem:[#allocation17_spill] sm:$0xff] %v4051_v37  ;;  %v4066_v56 = vsel %vm342_vm0, %v300_v52, 0  ;;  %v4839_v53 = vand.u32 4294901760, %v4037_v3 }
  0x37   : > { %v4062_v2 = vsub.f32 %v4007_v17, %v4834_v39  ;;  %4835 = vst [vmem:[#allocation18_spill] sm:$0xff] %v4066_v56  ;;  %v4071_v10 = vsub.f32 %v4011_v15, %v4836_v14  ;;  %v4840_v17 = vand.u32 4294901760, %v4051_v37  ;;  %v595_v39 = vand.u32 4294901760, %v3812_v26 }
  0x38   : > { %3190 = vmatpush3.bf16.xpose.msra.mxu0 %v3189_v1  ;;  %v4057_v1 = vsub.f32 %v3998_v20, %v4833_v42  ;;  %v4079_v20 = vsel %vm342_vm0, %v301_v54, 0  ;;  %v4085_v52 = vsub.f32 %v4037_v3, %v4839_v53  ;;  %v3193_v31 = vpack.c.bf16 %v3978_v38, %v3959_v7 }
  0x39   : > { %3192 = vmatprep.subr.bf16.mxu0 %v3191_v60  ;;  %v4837_v60 = vand.u32 4294901760, %v4026_v50  ;;  %4838 = vst [vmem:[#allocation19_spill] sm:$0xff] %v4079_v20  ;;  %v4090_v14 = vsub.f32 %v4051_v37, %v4840_v17  ;;  %v4844_v53 = vand.u32 4294901760, %v3777_v11  ;;  %v4845_v3 = vand.u32 4294901760, %v3784_v16 }
  0x3a   : > { %v4847_v17 = vand.u32 4294901760, %v3791_v21  ;;  %v4848_v15 = vand.u32 4294901760, %v3794_v22  ;;  %v3199_v11 = vpack.c.bf16 %v4032_v13, %v4022_v27  ;;  %v4850_v21 = vand.u32 4294901760, %v4066_v56 }
  0x3b   : > { %v4076_v42 = vsub.f32 %v4026_v50, %v4837_v60  ;;  %v4841_v60 = vand.u32 4294901760, %v3770_v8  ;;  %v4842_v50 = vand.u32 4294901760, %v3773_v9  ;;  %v4106_v62 = vpack.c.bf16 %v4845_v3, %v4844_v53 }
  0x3c   : > { %v4112_v8 = vpack.c.bf16 %v4848_v15, %v4847_v17  ;;  %v602_v9 = vand.u32 4294901760, %v3818_v28  ;;  %v4131_v22 = vsub.f32 %v4066_v56, %v4850_v21  ;;  %v4851_v17 = vand.u32 4294901760, %v4079_v20 }
  0x3d   : > { %v4097_v54 = vpack.c.bf16 %v4842_v50, %v4841_v60  ;;  %4846 = vst [vmem:[#allocation21_spill] sm:$0xff] %v4106_v62  ;;  %v3195_v50 = vpack.c.bf16 %v3993_v29, %v3983_v49  ;;  %v3197_v60 = vpack.c.bf16 %v4017_v19, %v4004_v61  ;;  %v4852_v15 = vand.u32 4294901760, %v3797_v23 }
  0x3e   : > { %4849 = vst [vmem:[#allocation22_spill] sm:$0xff] %v4112_v8  ;;  %v4139_v3 = vsub.f32 %v4079_v20, %v4851_v17  ;;  %v4853_v16 = vand.u32 4294901760, %v3822_v30  ;;  %v4854_v21 = vand.u32 4294901760, %v3856_v44  ;;  %v4855_v56 = vand.u32 4294901760, %v3859_v45 }
  0x3f   : > { %4843 = vst [vmem:[#allocation20_spill] sm:$0xff] %v4097_v54  ;;  %3116 = vmatprep.subr.bf16.mxu1 %v4097_v54  ;;  %v4856_v53 = vand.u32 4294901760, %v3862_v46  ;;  %v4857_v17 = vand.u32 4294901760, %v3870_v51  ;;  %v4859_v23 = vand.u32 4294901760, %v3890_v59  ;;  %v4861_v44 = vand.u32 4294901760, %v3908_v6 }
  0x40   : > { %3118 = vmatpush3.bf16.xpose.msra.mxu1 %v4106_v62  ;;  %v4146_v37 = vpack.c.bf16 %v4853_v16, %v4852_v15  ;;  %v4152_v62 = vpack.c.bf16 %v4855_v56, %v4854_v21  ;;  %3194 = vmatpush3.bf16.xpose.msra.mxu0 %v3193_v31  ;;  %v4860_v15 = vand.u32 4294901760, %v3896_v63  ;;  %v4862_v31 = vand.u32 4294901760, %v3920_v18 }
  0x41   : > { %3120 = vmatprep.subr.bf16.mxu1 %v4112_v8  ;;  %v4158_v20 = vpack.c.bf16 %v4857_v17, %v4856_v53  ;;  %v4858_v8 = vand.u32 4294901760, %v3876_v55  ;;  %v4863_v46 = vand.u32 4294901760, %v3934_v34  ;;  %3196 = vmatprep.subr.bf16.mxu0 %v3195_v50  ;;  %v551_v51 = vsub.f32 %v3758_v4, %v3952_v0 }
  0x42   : > { %v4170_v45 = vpack.c.bf16 %v4861_v44, %v4860_v15  ;;  %v707_v55 = vand.u32 4294901760, %v3802_v24  ;;  %v714_v59 = vand.u32 4294901760, %v3807_v25  ;;  %v596_v63 = vsub.f32 %v3812_v26, %v595_v39 }
  0x43   : > { %v4164_v30 = vpack.c.bf16 %v4859_v23, %v4858_v8  ;;  %v4176_v56 = vpack.c.bf16 %v4863_v46, %v4862_v31  ;;  %v603_v6 = vsub.f32 %v3818_v28, %v602_v9  ;;  %v4184_v8 = vpack.c.bf16 %v602_v9, %v595_v39 }
  0x44   : > { %v721_v18 = vand.u32 4294901760, %v3833_v36  ;;  %v728_v34 = vand.u32 4294901760, %v3842_v40  ;;  %v4188_v16 = vand.u32 4294901760, %v551_v51  ;;  %v708_v50 = vsub.f32 %v3802_v24, %v707_v55 }
  0x45   : > { %v715_v53 = vsub.f32 %v3807_v25, %v714_v59  ;;  %v597_v21 = vand.u32 4294901760, %v596_v63  ;;  %v604_v17 = vand.u32 4294901760, %v603_v6  ;;  %v4192_v23 = vpack.c.bf16 %v714_v59, %v707_v55 }
  0x46   : > { %v722_v26 = vsub.f32 %v3833_v36, %v721_v18  ;;  %v729_v28 = vsub.f32 %v3842_v40, %v728_v34  ;;  %2907 = vmatprep.mubr.f32.mxu1 %v4188_v16  ;;  %v709_v39 = vand.u32 4294901760, %v708_v50  ;;  %v609_v15 = vand.u32 4294901760, %v3847_v41 }
  0x47   : > { %v716_v9 = vand.u32 4294901760, %v715_v53  ;;  %v616_v44 = vand.u32 4294901760, %v3853_v43  ;;  %v4200_v24 = vpack.c.bf16 %v604_v17, %v597_v21  ;;  %v4202_v46 = vpack.c.bf16 %v728_v34, %v721_v18 }
  0x48   : > { %3122 = vmatpush3.bf16.xpose.msra.mxu1 %v4146_v37  ;;  %v723_v25 = vand.u32 4294901760, %v722_v26  ;;  %v730_v31 = vand.u32 4294901760, %v729_v28  ;;  %v610_v40 = vsub.f32 %v3847_v41, %v609_v15  ;;  %3198 = vmatpush3.bf16.xpose.msra.mxu0 %v3197_v60  ;;  %v735_v63 = vand.u32 4294901760, %v3882_v57 }
  0x49   : > { %3124 = vmatprep.subr.bf16.mxu1 %v4152_v62  ;;  %v4205_v36 = vpack.c.bf16 %v716_v9, %v709_v39  ;;  %v617_v51 = vsub.f32 %v3853_v43, %v616_v44  ;;  %v4209_v55 = vpack.c.bf16 %v616_v44, %v609_v15  ;;  %v742_v6 = vand.u32 4294901760, %v3887_v58  ;;  %3200 = vmatprep.subr.bf16.mxu0 %v3199_v11 }
  0x4a   : > { %v4211_v59 = vpack.c.bf16 %v730_v31, %v723_v25  ;;  %v623_v18 = vand.u32 4294901760, %v3905_v5  ;;  %v611_v34 = vand.u32 4294901760, %v610_v40  ;;  %v630_v53 = vand.u32 4294901760, %v3916_v12 }
  0x4b   : > { %v618_v50 = vand.u32 4294901760, %v617_v51  ;;  %v749_v41 = vand.u32 4294901760, %v3926_v32  ;;  %v736_v43 = vsub.f32 %v3882_v57, %v735_v63  ;;  %v743_v21 = vsub.f32 %v3887_v58, %v742_v6 }
  0x4c   : > { %v624_v60 = vsub.f32 %v3905_v5, %v623_v18  ;;  %v4221_v17 = vpack.c.bf16 %v742_v6, %v735_v63  ;;  %v631_v28 = vsub.f32 %v3916_v12, %v630_v53  ;;  %v4226_v39 = vpack.c.bf16 %v630_v53, %v623_v18 }
  0x4d   : > { %v4223_v26 = vpack.c.bf16 %v618_v50, %v611_v34  ;;  %v750_v11 = vsub.f32 %v3926_v32, %v749_v41  ;;  %v737_v9 = vand.u32 4294901760, %v736_v43  ;;  %v744_v15 = vand.u32 4294901760, %v743_v21 }
  0x4e   : > { %v625_v44 = vand.u32 4294901760, %v624_v60  ;;  %v756_v25 = vand.u32 4294901760, %v3931_v33  ;;  %v632_v57 = vand.u32 4294901760, %v631_v28  ;;  %v637_v58 = vand.u32 4294901760, %v3959_v7 }
  0x4f   : > { %v751_v31 = vand.u32 4294901760, %v750_v11  ;;  %v644_v5 = vand.u32 4294901760, %v3978_v38  ;;  %v4233_v40 = vpack.c.bf16 %v744_v15, %v737_v9  ;;  %v763_v32 = vand.u32 4294901760, %v3983_v49 }
  0x50   : > { %3126 = vmatpush3.bf16.xpose.msra.mxu1 %v4158_v20  ;;  %v757_v12 = vsub.f32 %v3931_v33, %v756_v25  ;;  %v4236_v51 = vpack.c.bf16 %v756_v25, %v749_v41  ;;  %v4240_v63 = vpack.c.bf16 %v632_v57, %v625_v44  ;;  %v638_v6 = vsub.f32 %v3959_v7, %v637_v58 }
  0x51   : > { %3128 = vmatprep.subr.bf16.mxu1 %v4164_v30  ;;  %v645_v18 = vsub.f32 %v3978_v38, %v644_v5  ;;  %v4244_v34 = vpack.c.bf16 %v644_v5, %v637_v58  ;;  %v4864_v50 = vpack.c.bf16 %v4048_v47, %v4043_v48  ;;  %v764_v33 = vsub.f32 %v3983_v49, %v763_v32 }
  0x52   : > { %v758_v53 = vand.u32 4294901760, %v757_v12  ;;  %v770_v41 = vand.u32 4294901760, %v3993_v29  ;;  %v651_v43 = vand.u32 4294901760, %v4004_v61  ;;  %v4865_v21 = vpack.c.bf16 %v4062_v2, %v4057_v1 }
  0x53   : > { %3202 = vmatpush3.bf16.xpose.msra.mxu0 %v4864_v50  ;;  %v639_v7 = vand.u32 4294901760, %v638_v6  ;;  %v646_v60 = vand.u32 4294901760, %v645_v18  ;;  %v658_v38 = vand.u32 4294901760, %v4017_v19  ;;  %v777_v28 = vand.u32 4294901760, %v4022_v27 }
  0x54   : > { %3204 = vmatprep.subr.bf16.mxu0 %v4865_v21  ;;  %v4257_v11 = vpack.c.bf16 %v758_v53, %v751_v31  ;;  %v765_v9 = vand.u32 4294901760, %v764_v33  ;;  %v771_v15 = vsub.f32 %v3993_v29, %v770_v41  ;;  %v652_v49 = vsub.f32 %v4004_v61, %v651_v43 }
  0x55   : > { %v4261_v44 = vpack.c.bf16 %v646_v60, %v639_v7  ;;  %v659_v25 = vsub.f32 %v4017_v19, %v658_v38  ;;  %v4264_v57 = vpack.c.bf16 %v770_v41, %v763_v32  ;;  %v4266_v58 = vpack.c.bf16 %v658_v38, %v651_v43 }
  0x56   : > { %v772_v5 = vand.u32 4294901760, %v771_v15  ;;  %v653_v12 = vand.u32 4294901760, %v652_v49  ;;  %v778_v6 = vsub.f32 %v4022_v27, %v777_v28  ;;  %v784_v31 = vand.u32 4294901760, %v4032_v13 }
  0x57   : > { %v660_v18 = vand.u32 4294901760, %v659_v25  ;;  %v665_v50 = vand.u32 4294901760, %v4043_v48  ;;  %v672_v29 = vand.u32 4294901760, %v4048_v47  ;;  %v791_v61 = vand.u32 4294901760, %v4057_v1 }
  0x58   : > { %3130 = vmatpush3.bf16.xpose.msra.mxu1 %v4170_v45  ;;  %v4274_v19 = vpack.c.bf16 %v772_v5, %v765_v9  ;;  %v779_v32 = vand.u32 4294901760, %v778_v6  ;;  %v785_v53 = vsub.f32 %v4032_v13, %v784_v31  ;;  %v4277_v33 = vpack.c.bf16 %v784_v31, %v777_v28 }
  0x59   : > { %3132 = vmatprep.subr.bf16.mxu1 %v4176_v56  ;;  %v4280_v27 = vpack.c.bf16 %v660_v18, %v653_v12  ;;  %v666_v41 = vsub.f32 %v4043_v48, %v665_v50  ;;  %v673_v43 = vsub.f32 %v4048_v47, %v672_v29  ;;  %v4284_v21 = vpack.c.bf16 %v672_v29, %v665_v50  ;;  %v4869_v47 = vld [vmem:[#allocation7_spill] sm:$0xff] }
  0x5a   : > { %v4866_v7 = vpack.c.bf16 %v4076_v42, %v4071_v10  ;;  %v786_v60 = vand.u32 4294901760, %v785_v53  ;;  %v792_v38 = vsub.f32 %v4057_v1, %v791_v61  ;;  %v798_v13 = vand.u32 4294901760, %v4062_v2  ;;  %v283_v1 = vld [vmem:[%s4768_s1 + $0x8] sm:$0xff]  ;;  %v4873_v53 = vld [vmem:[#allocation9_spill] sm:$0xff] }
  0x5b   : > { %v679_v28 = vand.u32 4294901760, %v4071_v10  ;;  %v4867_v9 = vpack.c.bf16 %v4090_v14, %v4085_v52  ;;  %v4868_v48 = vand.u32 4294901760, %v3937_v35  ;;  %v4870_v15 = vand.u32 4294901760, %v4869_v47  ;;  %v4871_v35 = vld [vmem:[#allocation8_spill] sm:$0xff] }
  0x5c   : > { %3206 = vmatpush3.bf16.xpose.msra.mxu0 %v4866_v7  ;;  %v667_v25 = vand.u32 4294901760, %v666_v41  ;;  %v674_v5 = vand.u32 4294901760, %v673_v43  ;;  %v686_v12 = vand.u32 4294901760, %v4076_v42  ;;  %v4305_v6 = vpack.c.bf16 %v786_v60, %v779_v32 }
  0x5d   : > { %3208 = vmatprep.subr.bf16.mxu0 %v4867_v9  ;;  %v4299_v49 = vpack.c.bf16 %v4870_v15, %v4868_v48  ;;  %v793_v31 = vand.u32 4294901760, %v792_v38  ;;  %v799_v18 = vsub.f32 %v4062_v2, %v798_v13  ;;  %v680_v50 = vsub.f32 %v4071_v10, %v679_v28 }
  0x5e   : > { %v4872_v29 = vand.u32 4294901760, %v4871_v35  ;;  %v4874_v7 = vand.u32 4294901760, %v4873_v53  ;;  %v4315_v41 = vpack.c.bf16 %v674_v5, %v667_v25  ;;  %v687_v43 = vsub.f32 %v4076_v42, %v686_v12  ;;  %v284_v42 = vld [vmem:[%s4768_s1 + $0x10] sm:$0xff] }
  0x5f   : > { %v4318_v48 = vpack.c.bf16 %v798_v13, %v791_v61  ;;  %v3209_v32 = vpack.c.bf16 %v4139_v3, %v4131_v22  ;;  %v800_v60 = vand.u32 4294901760, %v799_v18  ;;  %v681_v38 = vand.u32 4294901760, %v680_v50 }
  0x60   : > { %v4313_v9 = vpack.c.bf16 %v4874_v7, %v4872_v29  ;;  %v4322_v2 = vpack.c.bf16 %v686_v12, %v679_v28  ;;  %v347_v10 = vsel %vm342_vm0, %v283_v1, 0  ;;  %v688_v47 = vand.u32 4294901760, %v687_v43  ;;  %3134 = vmatpush3.bf16.xpose.msra.mxu1 %v4299_v49 }
  0x61   : > { %v805_v15 = vand.u32 4294901760, %v4085_v52  ;;  %v812_v35 = vand.u32 4294901760, %v4090_v14  ;;  %v4331_v61 = vpack.c.bf16 %v800_v60, %v793_v31  ;;  %v693_v13 = vand.u32 4294901760, %v4131_v22 }
  0x62   : > { %v700_v28 = vand.u32 4294901760, %v4139_v3  ;;  %3136 = vmatprep.subr.bf16.mxu1 %v4313_v9  ;;  %v4336_v25 = vpack.c.bf16 %v688_v47, %v681_v38  ;;  %v4342_v18 = vand.u32 4294901760, %v347_v10  ;;  %v350_v29 = vsel %vm342_vm0, %v284_v42, 0 }
  0x63   : > { %v806_v5 = vsub.f32 %v4085_v52, %v805_v15  ;;  %v813_v12 = vsub.f32 %v4090_v14, %v812_v35  ;;  %v4340_v1 = vpack.c.bf16 %v812_v35, %v805_v15  ;;  %v694_v31 = vsub.f32 %v4131_v22, %v693_v13  ;;  %v4875_v52 = vld [vmem:[#allocation10_spill] sm:$0xff]  ;;  %v4877_v14 = vld [vmem:[#allocation11_spill] sm:$0xff]  ;;  %v285_v22 = vld [vmem:[%s4768_s1 + $0x18] sm:$0xff] }
  0x64   : > { %3210 = vmatpush3.bf16.xpose.msra.mxu0 %v3209_v32  ;;  %v701_v50 = vsub.f32 %v4139_v3, %v700_v28  ;;  %v4348_v43 = vpack.c.bf16 %v700_v28, %v693_v13  ;;  %v4876_v60 = vand.u32 4294901760, %v4875_v52  ;;  %v4878_v38 = vand.u32 4294901760, %v4877_v14  ;;  %v4879_v15 = vld [vmem:[#allocation12_spill] sm:$0xff]  ;;  %v4887_v14 = vld [vmem:[#allocation15_spill] sm:$0xff] }
  0x65   : > { %3212 = vmatprep.subr.bf16.mxu0 %v4097_v54  ;;  %v807_v53 = vand.u32 4294901760, %v806_v5  ;;  %v814_v7 = vand.u32 4294901760, %v813_v12  ;;  %v695_v32 = vand.u32 4294901760, %v694_v31  ;;  %v4880_v35 = vand.u32 4294901760, %v4879_v15  ;;  %v4881_v54 = vld [vmem:[#allocation13_spill] sm:$0xff] }
  0x66   : > { %v4354_v47 = vpack.c.bf16 %v4878_v38, %v4876_v60  ;;  %v702_v3 = vand.u32 4294901760, %v701_v50  ;;  %v4882_v42 = vand.u32 4294901760, %v4881_v54  ;;  %v560_v28 = vsub.f32 %v347_v10, %v4342_v18  ;;  %v4883_v31 = vld [vmem:[#allocation21_spill] sm:$0xff]  ;;  %v4884_v10 = vld [vmem:[#allocation22_spill] sm:$0xff] }
  0x67   : > { %v4365_v13 = vpack.c.bf16 %v814_v7, %v807_v53  ;;  %v4368_v12 = vand.u32 4294901760, %v350_v29  ;;  %v353_v60 = vsel %vm342_vm0, %v285_v22, 0  ;;  %v4885_v53 = vld [vmem:[#allocation14_spill] sm:$0xff]  ;;  %v4888_v38 = vand.u32 4294901760, %v4887_v14 }
  0x68   : > { %v4363_v5 = vpack.c.bf16 %v4882_v42, %v4880_v35  ;;  %v4370_v52 = vpack.c.bf16 %v702_v3, %v695_v32  ;;  %3138 = vmatpush3.bf16.xpose.msra.mxu1 %v4354_v47  ;;  %v4378_v50 = vand.u32 4294901760, %v353_v60  ;;  %v4886_v7 = vand.u32 4294901760, %v4885_v53  ;;  %v4889_v32 = vld [vmem:[#allocation16_spill] sm:$0xff]  ;;  %v4891_v3 = vld [vmem:[#allocation17_spill] sm:$0xff]  ;;  %v4893_v42 = vld [vmem:[#allocation18_spill] sm:$0xff] }
  0x69   : > { %v571_v54 = vsub.f32 %v350_v29, %v4368_v12  ;;  %v4892_v15 = vand.u32 4294901760, %v4891_v3  ;;  %v4894_v53 = vand.u32 4294901760, %v4893_v42 }
  0x6a   : > { %3140 = vmatprep.subr.bf16.mxu1 %v4363_v5  ;;  %v4385_v22 = vpack.c.bf16 %v4888_v38, %v4886_v7  ;;  %v582_v29 = vsub.f32 %v353_v60, %v4378_v50  ;;  %v4895_v7 = vld [vmem:[#allocation19_spill] sm:$0xff] }
  0x6b   : > { %2988 = vmatmul.mubr.f32.vlgmr.msra.gmra.mrb[0].mxu0 %v3758_v4  ;;  %v4890_v4 = vand.u32 4294901760, %v4889_v32  ;;  %v4896_v14 = vand.u32 4294901760, %v4895_v7  ;;  %v561_v32 = vand.u32 4294901760, %v560_v28 }
  0x6c   : > { %3214 = vmatpush3.bf16.xpose.msra.mxu0 %v4883_v31  ;;  %2989 = vmatprep.mubr.f32.mxu0 %v560_v28  ;;  %v583_v42 = vand.u32 4294901760, %v582_v29 }
  0x6d   : > { %3216 = vmatprep.subr.bf16.mxu0 %v4884_v10  ;;  %v4391_v35 = vpack.c.bf16 %v4892_v15, %v4890_v4  ;;  %v4402_v38 = vpack.c.bf16 %v4896_v14, %v4894_v53  ;;  %v562_v60 = vsub.f32 %v560_v28, %v561_v32  ;;  %v572_v4 = vand.u32 4294901760, %v571_v54 }
  0x6e   : > { %v584_v7 = vsub.f32 %v582_v29, %v583_v42 }
  0x6f   : > { %2990 = vmatmul.mubr.f32.gmra.mrb[2].mxu0 %v560_v28  ;;  %v563_v3 = vand.u32 4294901760, %v562_v60  ;;  %v573_v15 = vsub.f32 %v571_v54, %v572_v4 }
  0x70   : > { %2991 = vmatprep.mubr.f32.mxu0 %v571_v54  ;;  %3142 = vmatpush3.bf16.xpose.msra.mxu1 %v4385_v22 }
  0x71   : > { %3144 = vmatprep.subr.bf16.mxu1 %v4391_v35  ;;  %v574_v53 = vand.u32 4294901760, %v573_v15  ;;  %v1463_v15 = vld [vmem:[%s4770_s3 + $0x10] sm:$0xff] }
  0x73   : > { %2992 = vmatmul.mubr.f32.gmra.mrb[4].mxu0 %v571_v54 }
  0x74   : > { %3218 = vmatpush3.bf16.xpose.msra.mxu0 %v4146_v37  ;;  %2993 = vmatprep.mubr.f32.mxu0 %v582_v29 }
  0x75   : > { %3220 = vmatprep.subr.bf16.mxu0 %v4152_v62 }
  0x77   : > { %2994 = vmatmul.mubr.f32.gmra.mrb[6].mxu0 %v582_v29 }
  0x78   : > { %3027 = vmatprep.mubr.f32.mxu0 %v3952_v0  ;;  %3146 = vmatpush3.bf16.xpose.msra.mxu1 %v4402_v38 }
  0x79   : > { %3148 = vmatprep.subr.bf16.mxu1 %v4205_v36  ;;  %v585_v36 = vand.u32 4294901760, %v584_v7 }
  0x7c   : > { %3222 = vmatpush3.bf16.xpose.msra.mxu0 %v4158_v20 }
  0x7d   : > { %3224 = vmatprep.subr.bf16.mxu0 %v4164_v30 }
  0x7f   : > { %2908 = vmatmul.mubr.f32.vlgmr.msra.gmra.mrb[0].mxu1 %v4188_v16  ;;  %v4897_v16 = vld [vmem:[#allocation6_spill] sm:$0xff] }
  0x80   : > { %3150 = vmatpush3.bf16.xpose.msra.mxu1 %v4200_v24  ;;  %2909 = vmatprep.mubr.f32.mxu1 %v563_v3  ;;  %v319_v24 = vld [vmem:[%s4769_s2 + $0x8] sm:$0xff] }
  0x81   : > { %3152 = vmatprep.subr.bf16.mxu1 %v4211_v59  ;;  %v1466_v59 = vld [vmem:[%s4771_s4 + $0x8] sm:$0xff] }
  0x83   : > { %2910 = vmatmul.mubr.f32.gmra.mrb[2].mxu1 %v563_v3 }
  0x84   : > { %3226 = vmatpush3.bf16.xpose.msra.mxu0 %v4170_v45  ;;  %2911 = vmatprep.mubr.f32.mxu1 %v574_v53 }
  0x85   : > { %3228 = vmatprep.subr.bf16.mxu0 %v4176_v56 }
  0x87   : > { %2912 = vmatmul.mubr.f32.gmra.mrb[4].mxu1 %v574_v53 }
  0x88   : > { %3154 = vmatpush3.bf16.xpose.msra.mxu1 %v4223_v26  ;;  %2913 = vmatprep.mubr.f32.mxu1 %v585_v36  ;;  %v1468_v26 = vld [vmem:[%s4771_s4 + $0x18] sm:$0xff] }
  0x89   : > { %3156 = vmatprep.subr.bf16.mxu1 %v4233_v40  ;;  %v4898_v40 = vld [vmem:[#allocation20_spill] sm:$0xff] }
  0x8b   : > { %2914 = vmatmul.mubr.f32.gmra.mrb[6].mxu1 %v585_v36 }
  0x8c   : > { %3230 = vmatpush3.bf16.xpose.msra.mxu0 %v4299_v49  ;;  %2947 = vmatprep.mubr.f32.mxu1 %v4897_v16 }
  0x8d   : > { %3232 = vmatprep.subr.bf16.mxu0 %v4313_v9 }
  0x90   : > { %3158 = vmatpush3.bf16.xpose.msra.mxu1 %v4240_v63  ;;  %v3656_v63 = vmov 0.0  }
  0x91   : > { %3160 = vmatprep.subr.bf16.mxu1 %v4257_v11 }
  0x94   : > { %3234 = vmatpush3.bf16.xpose.msra.mxu0 %v4354_v47 }
  0x95   : > { %3236 = vmatprep.subr.bf16.mxu0 %v4363_v5 }
  0x98   : > { %3162 = vmatpush3.bf16.xpose.msra.mxu1 %v4261_v44 }
  0x99   : > { %3164 = vmatprep.subr.bf16.mxu1 %v4274_v19 }
  0x9c   : > { %3238 = vmatpush3.bf16.xpose.msra.mxu0 %v4385_v22 }
  0x9d   : > { %3240 = vmatprep.subr.bf16.mxu0 %v4391_v35 }
  0xa0   : > { %3166 = vmatpush3.bf16.xpose.msra.mxu1 %v4280_v27 }
  0xa1   : > { %3168 = vmatprep.subr.bf16.mxu1 %v4305_v6  ;;  %v1461_v6 = vld [vmem:[%s4770_s3] sm:$0xff] }
  0xa4   : > { %3242 = vmatpush3.bf16.xpose.msra.mxu0 %v4402_v38 }
  0xa5   : > { %3244 = vmatprep.subr.bf16.mxu0 %v4192_v23  ;;  %v3655_v23 = vmov 0  }
  0xa6   : > { %3553 = vset.pattern.permute.xlu0 %v3655_v23  ;;  %3554 = vset.pattern.permute.xlu1 %v3655_v23 }
  0xa8   : > { %3170 = vmatpush3.bf16.xpose.msra.mxu1 %v4315_v41 }
  0xa9   : > { %3172 = vmatprep.subr.bf16.mxu1 %v4331_v61 }
  0xab   : > { %3028 = vmatmul.mubr.f32.vlgmr.msra.gmra.mrb[0].mxu0 %v3952_v0  ;;  %v318_v0 = vld [vmem:[%s4769_s2] sm:$0xff] }
  0xac   : > { %3246 = vmatpush3.bf16.xpose.msra.mxu0 %v4184_v8  ;;  %3029 = vmatprep.mubr.f32.mxu0 %v561_v32  ;;  %v320_v8 = vld [vmem:[%s4769_s2 + $0x10] sm:$0xff] }
  0xad   : > { %3248 = vmatprep.subr.bf16.mxu0 %v4202_v46  ;;  %324 = vperm.xlu0 %3553, %v318_v0   ;;  %v321_v46 = vld [vmem:[%s4769_s2 + $0x18] sm:$0xff] }
  0xae   : > { %334 = vperm.xlu1 %3554, %v320_v8   ;;  %v1497_v8 = vsel %vm1489_vm1, %v1463_v15, 0 }
  0xaf   : > { %3030 = vmatmul.mubr.f32.gmra.mrb[2].mxu0 %v561_v32 }
  0xb0   : > { %3031 = vmatprep.mubr.f32.mxu0 %v572_v4  ;;  %3174 = vmatpush3.bf16.xpose.msra.mxu1 %v4336_v25  ;;  %v1491_v25 = vsel %vm1489_vm1, %v1461_v6, 0 }
  0xb1   : > { %3176 = vmatprep.subr.bf16.mxu1 %v4365_v13  ;;  %329 = vperm.xlu0 %3553, %v319_v24   ;;  %v4524_v28 = vand.u32 4294901760, %v1491_v25 }
  0xb2   : > { %339 = vperm.xlu1 %3554, %v321_v46  }
  0xb3   : > { %3032 = vmatmul.mubr.f32.gmra.mrb[4].mxu0 %v572_v4 }
  0xb4   : > { %3250 = vmatpush3.bf16.xpose.msra.mxu0 %v4209_v55  ;;  %3033 = vmatprep.mubr.f32.mxu0 %v583_v42  ;;  %v1465_v55 = vld [vmem:[%s4771_s4] sm:$0xff] }
  0xb5   : > { %3252 = vmatprep.subr.bf16.mxu0 %v4221_v17  ;;  %1471 = vperm.xlu0 %3553, %v1465_v55   ;;  %v1467_v17 = vld [vmem:[%s4771_s4 + $0x10] sm:$0xff]  ;;  %v1464_v55 = vld [vmem:[%s4770_s3 + $0x18] sm:$0xff] }
  0xb6   : > { %1476 = vperm.xlu1 %3554, %v1466_v59  }
  0xb7   : > { %3034 = vmatmul.mubr.f32.gmra.mrb[6].mxu0 %v583_v42 }
  0xb8   : > { %3067 = vmatprep.mubr.f32.mxu0 %v4897_v16  ;;  %3178 = vmatpush3.bf16.xpose.msra.mxu1 %v4370_v52 }
  0xb9   : > { %1481 = vperm.xlu0 %3553, %v1467_v17  }
  0xba   : > { %1486 = vperm.xlu1 %3554, %v1468_v26  }
  0xbc   : > { %3254 = vmatpush3.bf16.xpose.msra.mxu0 %v4226_v39  ;;  %v2201_v39 = vld [vmem:[#allocation2] sm:$0x1] }
  0xbd   : > { %3256 = vmatprep.subr.bf16.mxu0 %v4236_v51  ;;  %2204 = vperm.xlu0 %3553, %v2201_v39  }
  0xbf   : > { %2948 = vmatmul.mubr.f32.vlgmr.msra.gmra.mrb[0].mxu1 %v4897_v16 }
  0xc0   : > { %2949 = vmatprep.mubr.f32.mxu1 %v4342_v18 }
  0xc3   : > { %2950 = vmatmul.mubr.f32.gmra.mrb[2].mxu1 %v4342_v18 }
  0xc4   : > { %3258 = vmatpush3.bf16.xpose.msra.mxu0 %v4244_v34  ;;  %2951 = vmatprep.mubr.f32.mxu1 %v4368_v12 }
  0xc5   : > { %3260 = vmatprep.subr.bf16.mxu0 %v4264_v57 }
  0xc7   : > { %2952 = vmatmul.mubr.f32.gmra.mrb[4].mxu1 %v4368_v12 }
  0xc8   : > { %2953 = vmatprep.mubr.f32.mxu1 %v4378_v50 }
  0xcb   : > { %2954 = vmatmul.mubr.f32.gmra.mrb[6].mxu1 %v4378_v50 }
  0xcc   : > { %3262 = vmatpush3.bf16.xpose.msra.mxu0 %v4266_v58  ;;  %1574 = vmatprep.mubr.f32.mxu1 %v3656_v63 }
  0xcd   : > { %3264 = vmatprep.subr.bf16.mxu0 %v4277_v33 }
  0xd4   : > { %3266 = vmatpush3.bf16.xpose.msra.mxu0 %v4284_v21 }
  0xd5   : > { %3268 = vmatprep.subr.bf16.mxu0 %v4318_v48 }
  0xdc   : > { %3270 = vmatpush3.bf16.xpose.msra.mxu0 %v4322_v2 }
  0xdd   : > { %3272 = vmatprep.subr.bf16.mxu0 %v4340_v1 }
  0xe4   : > { %3274 = vmatpush3.bf16.xpose.msra.mxu0 %v4348_v43  ;;  %v1462_v43 = vld [vmem:[%s4770_s3 + $0x8] sm:$0xff] }
  0xe5   : > { %3276 = vmatprep.subr.bf16.mxu0 %v4898_v40  ;;  %v1494_v54 = vsel %vm1489_vm1, %v1462_v43, 0 }
  0xe6   : > { %v4530_v32 = vand.u32 4294901760, %v1494_v54 }
  0xe8   : > { %v4541_v0 = vsub.f32 %v1494_v54, %v4530_v32 }
  0xeb   : > { %3068 = vmatmul.mubr.f32.vlgmr.msra.gmra.mrb[0].mxu0 %v4897_v16 }
  0xec   : > { %3278 = vmatpush3.bf16.xpose.msra.mxu0 %v4883_v31  ;;  %3069 = vmatprep.mubr.f32.mxu0 %v4342_v18 }
  0xed   : > { %3280 = vmatprep.subr.bf16.mxu0 %v4884_v10 }
  0xef   : > { %3070 = vmatmul.mubr.f32.gmra.mrb[2].mxu0 %v4342_v18 }
  0xf0   : > { %3071 = vmatprep.mubr.f32.mxu0 %v4368_v12 }
  0xf3   : > { %3072 = vmatmul.mubr.f32.gmra.mrb[4].mxu0 %v4368_v12 }
  0xf4   : > { %3282 = vmatpush3.bf16.xpose.msra.mxu0 %v4146_v37  ;;  %3073 = vmatprep.mubr.f32.mxu0 %v4378_v50 }
  0xf5   : > { %3284 = vmatprep.subr.bf16.mxu0 %v4152_v62 }
  0xf7   : > { %3074 = vmatmul.mubr.f32.gmra.mrb[6].mxu0 %v4378_v50 }
  0xf8   : > { %3107 = vmatprep.mubr.f32.mxu0 %v4897_v16 }
  0xfc   : > { %3286 = vmatpush3.bf16.xpose.msra.mxu0 %v4158_v20 }
  0xfd   : > { %3288 = vmatprep.subr.bf16.mxu0 %v4164_v30 }
 0x104   : > { %3290 = vmatpush3.bf16.xpose.msra.mxu0 %v4170_v45 }
 0x105   : > { %3292 = vmatprep.subr.bf16.mxu0 %v4176_v56 }
 0x10c   : > { %3294 = vmatpush3.bf16.xpose.msra.mxu0 %v4299_v49 }
 0x10d   : > { %3296 = vmatprep.subr.bf16.mxu0 %v4313_v9 }
 0x114   : > { %3298 = vmatpush3.bf16.xpose.msra.mxu0 %v4354_v47 }
 0x115   : > { %3300 = vmatprep.subr.bf16.mxu0 %v4363_v5 }
 0x11c   : > { %3302 = vmatpush3.bf16.xpose.msra.mxu0 %v4385_v22 }
 0x11d   : > { %3304 = vmatprep.subr.bf16.mxu0 %v4391_v35  ;;  %v4528_v35 = vsub.f32 %v1491_v25, %v4524_v28 }
 0x11f   : > { %v1577_v7 = vand.u32 4294901760, %v4528_v35 }
 0x121   : > { %v1578_v40 = vsub.f32 %v4528_v35, %v1577_v7 }
 0x124   : > { %3306 = vmatpush3.bf16.xpose.msra.mxu0 %v4402_v38 }
 0x12b   : > { %3108 = vmatmul.mubr.f32.vlgmr.msra.gmra.mrb[0].mxu0 %v4897_v16 }
 0x12c   : > { %3109 = vmatprep.mubr.f32.mxu0 %v4342_v18  ;;  %v325_v11 = vpop.permute.xlu0 %324 }
 0x12d   : > { %v335_v21 = vpop.permute.xlu1 %334 }
 0x12f   : > { %3110 = vmatmul.mubr.f32.gmra.mrb[2].mxu0 %v4342_v18 }
 0x130   : > { %3111 = vmatprep.mubr.f32.mxu0 %v4368_v12  ;;  %v330_v58 = vpop.permute.xlu0 %329 }
 0x131   : > { %v340_v5 = vpop.permute.xlu1 %339 }
 0x133   : > { %3112 = vmatmul.mubr.f32.gmra.mrb[4].mxu0 %v4368_v12 }
 0x134   : > { %3113 = vmatprep.mubr.f32.mxu0 %v4378_v50 }
 0x137   : > { %3114 = vmatmul.mubr.f32.gmra.mrb[6].mxu0 %v4378_v50 }
 0x138   : > { %2286 = vmatprep.mubr.f32.mxu0 %v3656_v63 }
 0x192   : > { %v819_v20 = vpop.f32.mrb[0].mxu1 }
 0x193   : > { %v821_v37 = vpop.f32.mrb[1].mxu1  ;;  %v3403_v44 = vadd.f32 %v819_v20, %v325_v11  ;;  %v4556_v20 = vand.u32 4294901760, %v1497_v8 }
 0x194   : > { %v3405_v57 = vadd.f32 %v821_v37, %v325_v11 }
 0x195   : > { %v4578_v6 = vsub.f32 %v1497_v8, %v4556_v20 }
 0x196   : > { %v826_v62 = vpop.f32.mrb[2].mxu1 }
 0x197   : > { %v828_v30 = vpop.f32.mrb[3].mxu1  ;;  %v3407_v9 = vadd.f32 %v826_v62, %v330_v58  ;;  %v1599_v15 = vand.u32 4294901760, %v4578_v6 }
 0x198   : > { %v3409_v41 = vadd.f32 %v828_v30, %v330_v58 }
 0x19a   : > { %v833_v45 = vpop.f32.mrb[4].mxu1 }
 0x19b   : > { %v835_v56 = vpop.f32.mrb[5].mxu1  ;;  %v3411_v18 = vadd.f32 %v833_v45, %v335_v21  ;;  %v1588_v45 = vand.u32 4294901760, %v4541_v0 }
 0x19c   : > { %v3413_v47 = vadd.f32 %v835_v56, %v335_v21  ;;  %v1500_v56 = vsel %vm1489_vm1, %v1464_v55, 0 }
 0x19e   : > { %v840_v51 = vpop.f32.mrb[6].mxu1 }
 0x19f   : > { %v842_v34 = vpop.f32.mrb[7].mxu1  ;;  %v3415_v50 = vadd.f32 %v840_v51, %v340_v5 }
 0x1a0   : > { %v3417_v10 = vadd.f32 %v842_v34, %v340_v5 }
 0x1fe   : > { %v1427_v19 = vpop.f32.mrb[0].mxu0 }
 0x1ff   : > { %v3404_v33 = vadd.f32 %v3403_v44, %v1427_v19  ;;  %v1429_v27 = vpop.f32.mrb[1].mxu0 }
 0x200   : > { %v3406_v49 = vadd.f32 %v3405_v57, %v1429_v27 }
 0x201   : > { %3555 = vtanh.f32 %v3404_v33 }
 0x202   : > { %3557 = vtanh.f32 %v3406_v49  ;;  %v1434_v48 = vpop.f32.mrb[2].mxu0 }
 0x203   : > { %v3408_v2 = vadd.f32 %v3407_v9, %v1434_v48  ;;  %v1436_v61 = vpop.f32.mrb[3].mxu0 }
 0x204   : > { %v3410_v1 = vadd.f32 %v3409_v41, %v1436_v61  ;;  %v4585_v61 = vand.u32 4294901760, %v1500_v56 }
 0x205   : > { %3559 = vtanh.f32 %v3408_v2 }
 0x206   : > { %3561 = vtanh.f32 %v3410_v1  ;;  %v1441_v13 = vpop.f32.mrb[4].mxu0  ;;  %v4604_v8 = vsub.f32 %v1500_v56, %v4585_v61  ;;  %v1600_v56 = vsub.f32 %v4578_v6, %v1599_v15 }
 0x207   : > { %v3412_v12 = vadd.f32 %v3411_v18, %v1441_v13  ;;  %v1443_v52 = vpop.f32.mrb[5].mxu0 }
 0x208   : > { %v3414_v31 = vadd.f32 %v3413_v47, %v1443_v52 }
 0x209   : > { %3563 = vtanh.f32 %v3412_v12 }
 0x20a   : > { %3565 = vtanh.f32 %v3414_v31  ;;  %v1448_v22 = vpop.f32.mrb[6].mxu0 }
 0x20b   : > { %v3556_v29 = vpop.eup %3555  ;;  %v3416_v14 = vadd.f32 %v3415_v50, %v1448_v22  ;;  %v1450_v38 = vpop.f32.mrb[7].mxu0 }
 0x20c   : > { %v3558_v60 = vpop.eup %3557  ;;  %v3418_v4 = vadd.f32 %v3417_v10, %v1450_v38  ;;  %v1504_v3 = vand.u32 4294901760, %v3556_v29  ;;  %v1579_v10 = vand.u32 4294901760, %v1578_v40 }
 0x20d   : > { %3567 = vtanh.f32 %v3416_v14  ;;  %v1502_v42 = vand.u32 4294901760, %v3558_v60 }
 0x20e   : > { %3569 = vtanh.f32 %v3418_v4  ;;  %v4535_v53 = vsub.f32 %v3556_v29, %v1504_v3 }
 0x20f   : > { %v3560_v36 = vpop.eup %3559  ;;  %v4538_v16 = vsub.f32 %v3558_v60, %v1502_v42  ;;  %v1589_v60 = vsub.f32 %v4541_v0, %v1588_v45 }
 0x210   : > { %v3562_v23 = vpop.eup %3561  ;;  %v1508_v24 = vand.u32 4294901760, %v3560_v36  ;;  %v1627_v46 = vand.u32 4294901760, %v4535_v53 }
 0x211   : > { %v1506_v59 = vand.u32 4294901760, %v3562_v23  ;;  %v1621_v17 = vand.u32 4294901760, %v4538_v16 }
 0x212   : > { %v4549_v26 = vpack.c.bf16 %v1508_v24, %v1504_v3  ;;  %v4551_v39 = vsub.f32 %v3560_v36, %v1508_v24  ;;  %v1628_v11 = vsub.f32 %v4535_v53, %v1627_v46 }
 0x213   : > { %v3564_v37 = vpop.eup %3563  ;;  %v4558_v62 = vpack.c.bf16 %v1506_v59, %v1502_v42  ;;  %v4560_v30 = vsub.f32 %v3562_v23, %v1506_v59  ;;  %v1622_v19 = vsub.f32 %v4538_v16, %v1621_v17 }
 0x214   : > { %v3566_v51 = vpop.eup %3565  ;;  %v1512_v34 = vand.u32 4294901760, %v3564_v37  ;;  %v1639_v44 = vand.u32 4294901760, %v4551_v39  ;;  %v3325_v57 = vpack.c.bf16 %v4551_v39, %v4535_v53  ;;  %v1629_v43 = vand.u32 4294901760, %v1628_v11 }
 0x215   : > { %3308 = vmatprep.subr.bf16.mxu1 %v4558_v62  ;;  %v1510_v58 = vand.u32 4294901760, %v3566_v51  ;;  %v1633_v33 = vand.u32 4294901760, %v4560_v30  ;;  %v3323_v27 = vpack.c.bf16 %v4560_v30, %v4538_v16  ;;  %v1623_v12 = vand.u32 4294901760, %v1622_v19 }
 0x216   : > { %3310 = vmatpush1.bf16.msra.mxu1 %v4549_v26  ;;  %v4574_v21 = vsub.f32 %v3564_v37, %v1512_v34  ;;  %v1640_v49 = vsub.f32 %v4551_v39, %v1639_v44  ;;  %v4580_v9 = vpack.c.bf16 %v1639_v44, %v1627_v46 }
 0x217   : > { %v3568_v41 = vpop.eup %3567  ;;  %v4582_v48 = vsub.f32 %v3566_v51, %v1510_v58  ;;  %v1634_v2 = vsub.f32 %v4560_v30, %v1633_v33  ;;  %v4587_v25 = vpack.c.bf16 %v1633_v33, %v1621_v17  ;;  %v1590_v17 = vand.u32 4294901760, %v1589_v60 }
 0x218   : > { %v3570_v1 = vpop.eup %3569  ;;  %v1516_v18 = vand.u32 4294901760, %v3568_v41  ;;  %v1641_v47 = vand.u32 4294901760, %v1640_v49  ;;  %v1651_v5 = vand.u32 4294901760, %v4574_v21 }
 0x219   : > { %v1514_v13 = vand.u32 4294901760, %v3570_v1  ;;  %v1635_v52 = vand.u32 4294901760, %v1634_v2  ;;  %v1645_v31 = vand.u32 4294901760, %v4582_v48 }
 0x21a   : > { %v4591_v54 = vpack.c.bf16 %v1516_v18, %v1512_v34  ;;  %v1662_v50 = vsub.f32 %v3568_v41, %v1516_v18  ;;  %v3317_v22 = vpack.c.bf16 %v1641_v47, %v1629_v43  ;;  %v1652_v4 = vsub.f32 %v4574_v21, %v1651_v5 }
 0x21b   : > { %v4593_v29 = vpack.c.bf16 %v1514_v13, %v1510_v58  ;;  %v1656_v14 = vsub.f32 %v3570_v1, %v1514_v13  ;;  %v3315_v38 = vpack.c.bf16 %v1635_v52, %v1623_v12  ;;  %v1646_v36 = vsub.f32 %v4582_v48, %v1645_v31 }
 0x21c   : > { %v1663_v3 = vand.u32 4294901760, %v1662_v50  ;;  %v3329_v42 = vpack.c.bf16 %v1662_v50, %v4574_v21  ;;  %v1653_v40 = vand.u32 4294901760, %v1652_v4  ;;  %v1610_v34 = vand.u32 4294901760, %v4604_v8 }
 0x21d   : > { %3312 = vmatprep.subr.bf16.mxu1 %v4593_v29  ;;  %v1657_v16 = vand.u32 4294901760, %v1656_v14  ;;  %v3327_v23 = vpack.c.bf16 %v1656_v14, %v4582_v48  ;;  %v1647_v30 = vand.u32 4294901760, %v1646_v36  ;;  %v1601_v58 = vand.u32 4294901760, %v1600_v56 }
 0x21e   : > { %3314 = vmatpush1.bf16.msra.mxu1 %v4591_v54  ;;  %v1664_v24 = vsub.f32 %v1662_v50, %v1663_v3  ;;  %v3345_v46 = vpack.c.bf16 %v1663_v3, %v1651_v5  ;;  %v1611_v19 = vsub.f32 %v4604_v8, %v1610_v34 }
 0x21f   : > { %3316 = vmatprep.subr.bf16.mxu1 %v3315_v38  ;;  %v1658_v55 = vsub.f32 %v1656_v14, %v1657_v16  ;;  %v3343_v59 = vpack.c.bf16 %v1657_v16, %v1645_v31 }
 0x220   : > { %v1665_v37 = vand.u32 4294901760, %v1664_v24  ;;  %v1612_v33 = vand.u32 4294901760, %v1611_v19 }
 0x221   : > { %1580 = vmatmul.mubr.f32.vlgmr.msra.gmra.mrb[8].mxu1 %v1579_v10  ;;  %v1659_v51 = vand.u32 4294901760, %v1658_v55 }
 0x222   : > { %3318 = vmatpush1.bf16.msra.mxu1 %v3317_v22  ;;  %1585 = vmatprep.mubr.f32.mxu1 %v3656_v63  ;;  %v3321_v11 = vpack.c.bf16 %v1665_v37, %v1653_v40 }
 0x223   : > { %v3319_v44 = vpack.c.bf16 %v1659_v51, %v1647_v30 }
 0x225   : > { %1591 = vmatmul.mubr.f32.gmra.mrb[10].mxu1 %v1590_v17  ;;  %3320 = vmatprep.subr.bf16.mxu1 %v3319_v44 }
 0x226   : > { %3322 = vmatpush1.bf16.msra.mxu1 %v3321_v11  ;;  %1596 = vmatprep.mubr.f32.mxu1 %v3656_v63 }
 0x227   : > { %3324 = vmatprep.subr.bf16.mxu1 %v3323_v27 }
 0x229   : > { %1602 = vmatmul.mubr.f32.gmra.mrb[12].mxu1 %v1601_v58 }
 0x22a   : > { %1607 = vmatprep.mubr.f32.mxu1 %v3656_v63 }
 0x22d   : > { %1613 = vmatmul.mubr.f32.gmra.mrb[14].mxu1 %v1612_v33 }
 0x22e   : > { %1723 = vmatprep.mubr.f32.mxu1 %v3656_v63 }
 0x231   : > { %1725 = vmatmul.mubr.f32.vlgmr.msra.gmra.mrb[8].mxu1 %v4524_v28 }
 0x232   : > { %3326 = vmatpush1.bf16.msra.mxu1 %v3325_v57  ;;  %1730 = vmatprep.mubr.f32.mxu1 %v3656_v63 }
 0x233   : > { %3328 = vmatprep.subr.bf16.mxu1 %v3327_v23 }
 0x235   : > { %1732 = vmatmul.mubr.f32.gmra.mrb[10].mxu1 %v4530_v32 }
 0x236   : > { %3330 = vmatpush1.bf16.msra.mxu1 %v3329_v42  ;;  %1737 = vmatprep.mubr.f32.mxu1 %v3656_v63 }
 0x237   : > { %3332 = vmatprep.subr.bf16.mxu1 %v4558_v62 }
 0x239   : > { %1739 = vmatmul.mubr.f32.gmra.mrb[12].mxu1 %v4556_v20 }
 0x23a   : > { %1744 = vmatprep.mubr.f32.mxu1 %v3656_v63 }
 0x23d   : > { %1746 = vmatmul.mubr.f32.gmra.mrb[14].mxu1 %v4585_v61 }
 0x23e   : > { %1832 = vmatprep.mubr.f32.mxu1 %v3656_v63 }
 0x241   : > { %1835 = vmatmul.mubr.f32.vlgmr.msra.gmra.mrb[8].mxu1 %v4528_v35  ;;  %v1472_v35 = vpop.permute.xlu0 %1471 }
 0x242   : > { %3334 = vmatpush1.bf16.msra.mxu1 %v4549_v26  ;;  %1840 = vmatprep.mubr.f32.mxu1 %v3656_v63 }
 0x243   : > { %3336 = vmatprep.subr.bf16.mxu1 %v4593_v29 }
 0x245   : > { %1843 = vmatmul.mubr.f32.gmra.mrb[10].mxu1 %v4541_v0  ;;  %v1482_v57 = vpop.permute.xlu0 %1481 }
 0x246   : > { %3338 = vmatpush1.bf16.msra.mxu1 %v4591_v54  ;;  %1848 = vmatprep.mubr.f32.mxu1 %v3656_v63 }
 0x247   : > { %3340 = vmatprep.subr.bf16.mxu1 %v4587_v25 }
 0x249   : > { %1851 = vmatmul.mubr.f32.gmra.mrb[12].mxu1 %v4578_v6 }
 0x24a   : > { %1856 = vmatprep.mubr.f32.mxu1 %v3656_v63 }
 0x24d   : > { %1859 = vmatmul.mubr.f32.gmra.mrb[14].mxu1 %v4604_v8 }
 0x24e   : > { %1937 = vmatprep.mubr.f32.mxu1 %v3656_v63 }
 0x251   : > { %1941 = vmatmul.mubr.f32.vlgmr.msra.gmra.mrb[8].mxu1 %v1577_v7 }
 0x252   : > { %3342 = vmatpush1.bf16.msra.mxu1 %v4580_v9  ;;  %1946 = vmatprep.mubr.f32.mxu1 %v3656_v63 }
 0x253   : > { %3344 = vmatprep.subr.bf16.mxu1 %v3343_v59 }
 0x255   : > { %1950 = vmatmul.mubr.f32.gmra.mrb[10].mxu1 %v1588_v45 }
 0x256   : > { %3346 = vmatpush1.bf16.msra.mxu1 %v3345_v46  ;;  %1955 = vmatprep.mubr.f32.mxu1 %v3656_v63 }
 0x257   : > { %3348 = vmatprep.subr.bf16.mxu1 %v4558_v62 }
 0x259   : > { %1959 = vmatmul.mubr.f32.gmra.mrb[12].mxu1 %v1599_v15 }
 0x25a   : > { %1964 = vmatprep.mubr.f32.mxu1 %v3656_v63 }
 0x25d   : > { %1968 = vmatmul.mubr.f32.gmra.mrb[14].mxu1 %v1610_v34 }
 0x25e   : > { %2062 = vmatprep.mubr.f32.mxu1 %v3656_v63 }
 0x261   : > { %2064 = vmatmul.mubr.f32.vlgmr.msra.gmra.mrb[8].mxu1 %v4524_v28 }
 0x262   : > { %3350 = vmatpush1.bf16.msra.mxu1 %v4549_v26  ;;  %2069 = vmatprep.mubr.f32.mxu1 %v3656_v63 }
 0x263   : > { %3352 = vmatprep.subr.bf16.mxu1 %v4593_v29 }
 0x265   : > { %2071 = vmatmul.mubr.f32.gmra.mrb[10].mxu1 %v4530_v32 }
 0x266   : > { %3354 = vmatpush1.bf16.msra.mxu1 %v4591_v54  ;;  %2076 = vmatprep.mubr.f32.mxu1 %v3656_v63 }
 0x269   : > { %2078 = vmatmul.mubr.f32.gmra.mrb[12].mxu1 %v4556_v20 }
 0x26a   : > { %2083 = vmatprep.mubr.f32.mxu1 %v3656_v63 }
 0x26d   : > { %2085 = vmatmul.mubr.f32.gmra.mrb[14].mxu1 %v4585_v61 }
 0x26e   : > { %2163 = vmatprep.mubr.f32.mxu1 %v3656_v63 }
 0x271   : > { %2165 = vmatmul.mubr.f32.vlgmr.msra.gmra.mrb[8].mxu1 %v4524_v28  ;;  %v1477_v28 = vpop.permute.xlu1 %1476 }
 0x272   : > { %2170 = vmatprep.mubr.f32.mxu1 %v3656_v63 }
 0x275   : > { %2172 = vmatmul.mubr.f32.gmra.mrb[10].mxu1 %v4530_v32  ;;  %v1487_v41 = vpop.permute.xlu1 %1486 }
 0x276   : > { %2177 = vmatprep.mubr.f32.mxu1 %v3656_v63 }
 0x279   : > { %2179 = vmatmul.mubr.f32.gmra.mrb[12].mxu1 %v4556_v20  ;;  %v2200_v20 = vld [vmem:[%s4772_s5] sm:$0x1] }
 0x27a   : > { %2184 = vmatprep.mubr.f32.mxu1 %v3656_v63  ;;  %v2212_v9 = vsel %vm1489_vm1, %v2200_v20, 0 }
 0x27b   : > { %v4676_v1 = vand.u32 4294901760, %v2212_v9 }
 0x27d   : > { %2186 = vmatmul.mubr.f32.gmra.mrb[14].mxu1 %v4585_v61  ;;  %v4683_v31 = vsub.f32 %v2212_v9, %v4676_v1 }
 0x27e   : > { %2402 = vmatprep.mubr.f32.mxu1 %v3656_v63 }
 0x27f   : > { %v2289_v15 = vand.u32 4294901760, %v4683_v31 }
 0x281   : > { %v2290_v34 = vsub.f32 %v4683_v31, %v2289_v15 }
 0x344   : > { %v2166_v53 = vpop.f32.mrb[8].mxu1 }
 0x345   : > { %v3419_v7 = vadd.f32 %v2166_v53, %v1472_v35  ;;  %v2168_v0 = vpop.f32.mrb[9].mxu1 }
 0x346   : > { %v3420_v26 = vadd.f32 %v2168_v0, %v1472_v35 }
 0x347   : > { %3571 = vtanh.f32 %v3419_v7 }
 0x348   : > { %3573 = vtanh.f32 %v3420_v26  ;;  %v2173_v39 = vpop.f32.mrb[10].mxu1 }
 0x349   : > { %v3421_v32 = vadd.f32 %v2173_v39, %v1477_v28  ;;  %v2175_v62 = vpop.f32.mrb[11].mxu1 }
 0x34a   : > { %v3422_v45 = vadd.f32 %v2175_v62, %v1477_v28 }
 0x34b   : > { %3575 = vtanh.f32 %v3421_v32 }
 0x34c   : > { %3577 = vtanh.f32 %v3422_v45  ;;  %v2180_v27 = vpop.f32.mrb[12].mxu1 }
 0x34d   : > { %v3423_v21 = vadd.f32 %v2180_v27, %v1482_v57  ;;  %v2182_v49 = vpop.f32.mrb[13].mxu1 }
 0x34e   : > { %v3424_v6 = vadd.f32 %v2182_v49, %v1482_v57  ;;  %v2291_v49 = vand.u32 4294901760, %v2290_v34 }
 0x34f   : > { %3579 = vtanh.f32 %v3423_v21 }
 0x350   : > { %3581 = vtanh.f32 %v3424_v6  ;;  %v2187_v48 = vpop.f32.mrb[14].mxu1 }
 0x351   : > { %v3572_v2 = vpop.eup %3571  ;;  %v3425_v61 = vadd.f32 %v2187_v48, %v1487_v41  ;;  %v2189_v25 = vpop.f32.mrb[15].mxu1 }
 0x352   : > { %v3574_v18 = vpop.eup %3573  ;;  %v3426_v43 = vadd.f32 %v2189_v25, %v1487_v41  ;;  %v2216_v47 = vand.u32 4294901760, %v3572_v2 }
 0x353   : > { %3583 = vtanh.f32 %v3425_v61  ;;  %v2214_v5 = vand.u32 4294901760, %v3574_v18 }
 0x354   : > { %3585 = vtanh.f32 %v3426_v43  ;;  %v4678_v13 = vsub.f32 %v3572_v2, %v2216_v47 }
 0x355   : > { %v3576_v12 = vpop.eup %3575  ;;  %v4680_v52 = vsub.f32 %v3574_v18, %v2214_v5 }
 0x356   : > { %v3578_v54 = vpop.eup %3577  ;;  %v2220_v50 = vand.u32 4294901760, %v3576_v12  ;;  %v2306_v10 = vand.u32 4294901760, %v4678_v13 }
 0x357   : > { %v2218_v22 = vand.u32 4294901760, %v3578_v54  ;;  %v2300_v29 = vand.u32 4294901760, %v4680_v52 }
 0x358   : > { %v4687_v14 = vpack.c.bf16 %v2220_v50, %v2216_v47  ;;  %v4689_v38 = vsub.f32 %v3576_v12, %v2220_v50  ;;  %v2307_v16 = vsub.f32 %v4678_v13, %v2306_v10 }
 0x359   : > { %v3580_v60 = vpop.eup %3579  ;;  %v4691_v4 = vpack.c.bf16 %v2218_v22, %v2214_v5  ;;  %v2311_v3 = vsub.f32 %v3578_v54, %v2218_v22  ;;  %v2301_v46 = vsub.f32 %v4680_v52, %v2300_v29  ;;  %v2207_v54 = vlaneseq  ;;  %v2205_v22 = vpop.permute.xlu0 %2204 }
 0x35a   : > { %v3582_v42 = vpop.eup %3581  ;;  %v2224_v36 = vand.u32 4294901760, %v3580_v60  ;;  %v2318_v8 = vand.u32 4294901760, %v4689_v38  ;;  %v3373_v23 = vpack.c.bf16 %v4689_v38, %v4678_v13  ;;  %v2308_v19 = vand.u32 4294901760, %v2307_v16 }
 0x35b   : > { %3356 = vmatprep.subr.bf16.mxu0 %v4691_v4  ;;  %v2222_v24 = vand.u32 4294901760, %v3582_v42  ;;  %v2312_v55 = vand.u32 4294901760, %v2311_v3  ;;  %v3371_v59 = vpack.c.bf16 %v2311_v3, %v4680_v52  ;;  %v2302_v7 = vand.u32 4294901760, %v2301_v46 }
 0x35c   : > { %3358 = vmatpush1.bf16.msra.mxu0 %v4687_v14  ;;  %v2329_v17 = vsub.f32 %v3580_v60, %v2224_v36  ;;  %v2319_v40 = vsub.f32 %v4689_v38, %v2318_v8  ;;  %v3389_v37 = vpack.c.bf16 %v2318_v8, %v2306_v10  ;;  %v2208_v50 = vshrl.u32 %v2207_v54, 7 }
 0x35d   : > { %v3584_v30 = vpop.eup %3583  ;;  %v2323_v51 = vsub.f32 %v3582_v42, %v2222_v24  ;;  %v2313_v56 = vsub.f32 %v2311_v3, %v2312_v55  ;;  %v3387_v11 = vpack.c.bf16 %v2312_v55, %v2300_v29  ;;  %vm2785_vm2 = vcmp.lt.s32.totalorder %v2207_v54, 256 }
 0x35e   : > { %v3586_v44 = vpop.eup %3585  ;;  %v2228_v58 = vand.u32 4294901760, %v3584_v30  ;;  %v2320_v33 = vand.u32 4294901760, %v2319_v40  ;;  %v2330_v35 = vand.u32 4294901760, %v2329_v17  ;;  %v2209_v10 = vsub.s32 0, %v2208_v50 }
 0x35f   : > { %v2226_v53 = vand.u32 4294901760, %v3586_v44  ;;  %v2314_v0 = vand.u32 4294901760, %v2313_v56  ;;  %v2324_v26 = vand.u32 4294901760, %v2323_v51 }
 0x360   : > { %v3361_v28 = vpack.c.bf16 %v2228_v58, %v2224_v36  ;;  %v2341_v39 = vsub.f32 %v3584_v30, %v2228_v58  ;;  %v3365_v32 = vpack.c.bf16 %v2320_v33, %v2308_v19  ;;  %v2331_v57 = vsub.f32 %v2329_v17, %v2330_v35 }
 0x361   : > { %v3359_v62 = vpack.c.bf16 %v2226_v53, %v2222_v24  ;;  %v2335_v45 = vsub.f32 %v3586_v44, %v2226_v53  ;;  %v3363_v20 = vpack.c.bf16 %v2314_v0, %v2302_v7  ;;  %v2325_v6 = vsub.f32 %v2323_v51, %v2324_v26 }
 0x362   : > { %v2342_v27 = vand.u32 4294901760, %v2341_v39  ;;  %v3377_v21 = vpack.c.bf16 %v2341_v39, %v2329_v17  ;;  %v2332_v18 = vand.u32 4294901760, %v2331_v57  ;;  %v2210_v29 = vrot.slane %v2205_v22, %v2209_v10 }
 0x363   : > { %3360 = vmatprep.subr.bf16.mxu0 %v3359_v62  ;;  %3364 = vmatprep.subr.bf16.mxu1 %v3363_v20  ;;  %v2336_v9 = vand.u32 4294901760, %v2335_v45  ;;  %v3375_v41 = vpack.c.bf16 %v2335_v45, %v2323_v51  ;;  %v2326_v47 = vand.u32 4294901760, %v2325_v6  ;;  %v3657_v36 = vmov 1966171168  }
 0x364   : > { %3362 = vmatpush1.bf16.msra.mxu0 %v3361_v28  ;;  %3366 = vmatpush1.bf16.msra.mxu1 %v3365_v32  ;;  %v2343_v48 = vsub.f32 %v2341_v39, %v2342_v27  ;;  %v3393_v2 = vpack.c.bf16 %v2342_v27, %v2330_v35 }
 0x365   : > { %v2337_v61 = vsub.f32 %v2335_v45, %v2336_v9  ;;  %v3391_v25 = vpack.c.bf16 %v2336_v9, %v2324_v26 }
 0x366   : > { %v2344_v43 = vand.u32 4294901760, %v2343_v48 }
 0x367   : > { %2292 = vmatmul.mubr.f32.vlgmr.msra.gmra.mrb[8].mxu0 %v2291_v49  ;;  %v2338_v5 = vand.u32 4294901760, %v2337_v61 }
 0x368   : > { %v3369_v13 = vpack.c.bf16 %v2344_v43, %v2332_v18 }
 0x369   : > { %v3367_v12 = vpack.c.bf16 %v2338_v5, %v2326_v47 }
 0x36b   : > { %3368 = vmatprep.subr.bf16.mxu1 %v3367_v12 }
 0x36c   : > { %3370 = vmatpush1.bf16.msra.mxu1 %v3369_v13 }
 0x36d   : > { %3372 = vmatprep.subr.bf16.mxu1 %v3371_v59 }
 0x36f   : > { %2404 = vmatmul.mubr.f32.vlgmr.msra.gmra.mrb[16].mxu1 %v4676_v1 }
 0x370   : > { %3374 = vmatpush1.bf16.msra.mxu1 %v3373_v23  ;;  %2490 = vmatprep.mubr.f32.mxu1 %v3656_v63 }
 0x371   : > { %3376 = vmatprep.subr.bf16.mxu1 %v3375_v41 }
 0x374   : > { %3378 = vmatpush1.bf16.msra.mxu1 %v3377_v21 }
 0x375   : > { %3380 = vmatprep.subr.bf16.mxu1 %v4691_v4 }
 0x377   : > { %2493 = vmatmul.mubr.f32.vlgmr.msra.gmra.mrb[16].mxu1 %v4683_v31 }
 0x378   : > { %3382 = vmatpush1.bf16.msra.mxu1 %v4687_v14  ;;  %2571 = vmatprep.mubr.f32.mxu1 %v3656_v63 }
 0x379   : > { %3384 = vmatprep.subr.bf16.mxu1 %v3359_v62 }
 0x37c   : > { %3386 = vmatpush1.bf16.msra.mxu1 %v3361_v28 }
 0x37d   : > { %3388 = vmatprep.subr.bf16.mxu1 %v3387_v11 }
 0x37f   : > { %2575 = vmatmul.mubr.f32.vlgmr.msra.gmra.mrb[16].mxu1 %v2289_v15 }
 0x380   : > { %3390 = vmatpush1.bf16.msra.mxu1 %v3389_v37  ;;  %2669 = vmatprep.mubr.f32.mxu1 %v3656_v63 }
 0x381   : > { %3392 = vmatprep.subr.bf16.mxu1 %v3391_v25 }
 0x384   : > { %3394 = vmatpush1.bf16.msra.mxu1 %v3393_v2 }
 0x385   : > { %3396 = vmatprep.subr.bf16.mxu1 %v4691_v4 }
 0x387   : > { %2671 = vmatmul.mubr.f32.vlgmr.msra.gmra.mrb[16].mxu1 %v4676_v1 }
 0x388   : > { %3398 = vmatpush1.bf16.msra.mxu1 %v4687_v14  ;;  %2749 = vmatprep.mubr.f32.mxu1 %v3656_v63 }
 0x389   : > { %3400 = vmatprep.subr.bf16.mxu1 %v3359_v62 }
 0x38c   : > { %3402 = vmatpush1.bf16.msra.mxu1 %v3361_v28 }
 0x38f   : > { %2751 = vmatmul.mubr.f32.vlgmr.msra.gmra.mrb[16].mxu1 %v4676_v1  ;;  %v2769_v1 = vunpack.c.l.s4 %v3657_v36 }
 0x391   : > { %v2770_v8 = vunpack.c.0.s8 %v2769_v1 }
 0x393   : > { %v2773_v59 = vsub.s32 %v2770_v8, %v2208_v50 }
 0x43a   : > { %v2293_v52 = vpop.f32.mrb[8].mxu0 }
 0x43b   : > { %v2295_v31 = vpop.f32.mrb[9].mxu0  ;;  %v2294_v38 = vadd.f32 %v2293_v52, %v2210_v29 }
 0x43c   : > { %v2296_v60 = vadd.f32 %v2295_v31, %v2210_v29 }
 0x462   : > { %v2752_v4 = vpop.f32.mrb[16].mxu1 }
 0x463   : > { %v3428_v3 = vadd.f32 %v2752_v4, %v2294_v38  ;;  %v2754_v15 = vpop.f32.mrb[17].mxu1 }
 0x464   : > { %v3430_v14 = vadd.f32 %v2754_v15, %v2296_v60 }
 0x465   : > { %v2757_v42 = vmul.f32 0.5, %v3428_v3 }
 0x466   : > { %v2758_v63 = vmul.f32 0.5, %v3430_v14 }
 0x467   : > { %3587 = vtanh.f32 %v2757_v42 }
 0x468   : > { %3589 = vtanh.f32 %v2758_v63 }
 0x471   : > { %v3588_v16 = vpop.eup %3587 }
 0x472   : > { %v3590_v23 = vpop.eup %3589  ;;  %v2761_v24 = vmul.f32 0.25, %v3588_v16 }
 0x473   : > { %v2762_v46 = vmul.f32 0.25, %v3590_v23 }
 0x474   : > { %v2763_v55 = vadd.f32 0.3, %v2761_v24 }
 0x475   : > { %v2764_v17 = vadd.f32 0.3, %v2762_v46 }
 0x477   : > { %v2767_v40 = vcombine.low %v2763_v55, %v2764_v17 }
 0x479   : > { %v2774_v37 = vrot.slane %v2767_v40, %v2773_v59 }
 0x47b   : > { %v2781_v30 = vrot.slane %v2774_v37, %v2773_v59 }
 0x47d   : > { %2787 = vst.msk [vmem:[%s274_s6] sm:$0x3] %vm2785_vm2, %v2781_v30 }
 0x47e   : > { %3604 = shalt.err (!%p3601_p3)
}
 0x47f   : > { %s3605_s14 = scalar_lea.hbm %s4725_s15, 32  ;;  %s3609_s23 = scalar_lea.hbm %s4774_s7, 64 }
 0x480   : > { %p3606_p4 = scmp.ne.s32.totalorder %s4725_s15, %s3605_s14  ;;  %p3610_p9 = scmp.lt.u32.totalorder %s4725_s15, %s4774_s7 }
 0x481   : > { %p3611_p10 = scmp.lt.u32.totalorder %s3609_s23, %s3605_s14  ;;  %p3613_p12 = scmp.lt.u32.totalorder %s3605_s14, %s4725_s15 }
 0x482   : > { %p3607_p7 = pnand %p3606_p4, %p3737_p5 }
 0x483   : > { %p3612_p11 = por %p3611_p10, %p3610_p9 }
 0x484   : > { %p3608_p8 = pneg %p3607_p7 }
 0x485   : > { %p3614_p13 = por %p3613_p12, %p3612_p11 }
 0x487   : > { %p3615_p0 = pnand %p3614_p13, %p3608_p8 }
 0x489   : > { %3618 = shalt.err (!%p3615_p0)
}
 0x48a   : > { %3511 = dma.vmem_to_hbm [thread:$0]  (%p3737_p5), %s4727_s30, 32, %s4725_s15, %s2789_s16  }
 0x48b PF: > { %p3517_p1 = scmp.ge.s32.totalorder %s3653_s29, 2  ;;  %s2815_s6 = sand.u32 1, %s3641_s26  }
 0x48c   : > { %s2816_s9 = scalar_lea.sflag [#allocation4], %s2815_s6 }
 0x48d   : > { %p3514_p2 = pnand %p3517_p1, %p3741_p6 }
 0x48f   : > { %3636 = dma.done.wait (!%p3514_p2), %s2816_s9, 32  }
 0x490   : > { %3638 = vsyncadd (!%p3514_p2), %s2816_s9, 4294967264  ;;  %p19_p3 = scmp.ge.s32.totalorder %s3725_s8, 4   ;;  %s4899_s26 = smov %s3645_s27 }
 0x491   : > { %s4900_s27 = smov %s3649_s28  ;;  %s4901_s28 = smov %s3735_s11 }
 0x492   : > { %s4902_s29 = smov %s3725_s8  ;;  %21 = sbr.rel (!%p19_p3) target bundleno = 6 (0x6), region = 83 }
 0x499   :  { %2821 = vsyncpa [#allocation4], 1 }
 0x49a   :  { %2823 = vsyncpa [#allocation4 + $0x1], 1 }

</bundles_post_ra>
